<compile_context>
chip_gen: v7x
topology: tpu7x:2x2x1
jax: 0.10.0
libtpu: 0.0.40
codegen_flags: <defaults>
</compile_context>

<pallas_src>
import jax
import jax.numpy as jnp
from jax.experimental import pallas as pl
from jax.experimental.pallas import tpu as pltpu

_LANE = 128


def _spectral_mul_kernel(xr_ref, xi_ref, wr_ref, wi_ref, or_ref, oi_ref):
    """One grid step = one lane-tile of Mt modes.

    xr/xi : (B, Ci, Mt)   real / imag of truncated x_ft (modes on lanes)
    wr/wi : (Ci, Co, Mt)  real / imag of weights        (modes on lanes)
    or/oi : (B, Co, Mt)   real / imag of out_ft         (modes on lanes)
    """
    xr = xr_ref[...]
    xi = xi_ref[...]
    wr = wr_ref[...]
    wi = wi_ref[...]
    Ci = xr.shape[1]

    def term(i):
        xr_i = xr[:, i:i + 1, :]          # (B, 1, Mt)
        xi_i = xi[:, i:i + 1, :]
        wr_i = wr[i][None, :, :]          # (1, Co, Mt)
        wi_i = wi[i][None, :, :]
        # (a + ib)(c + id) = (ac - bd) + i(ad + bc)
        return (xr_i * wr_i - xi_i * wi_i,
                xr_i * wi_i + xi_i * wr_i)

    # Initialise the accumulators with the i = 0 term (saves a zero-init+add),
    # then unroll the remaining tiny channel loop on the VPU.
    acc_r, acc_i = term(0)
    for i in range(1, Ci):
        tr, ti = term(i)
        acc_r = acc_r + tr
        acc_i = acc_i + ti

    or_ref[...] = acc_r
    oi_ref[...] = acc_i


def _round_up(x, m):
    return ((x + m - 1) // m) * m


def _choose_mode_tile(m_pad, b, ci, co, budget_bytes=24 << 20):
    """Largest multiple-of-128 divisor of m_pad that fits the VMEM budget.

    Prefers a single grid step (tile == m_pad) when the whole problem fits —
    these spectra are small and per-step pipeline overhead dominates otherwise.
    """
    # all six f32 blocks (4 in + 2 out), double-buffered, per lane column
    bytes_per_lane = 2 * 4 * (2 * b * ci + 2 * ci * co + 2 * b * co)
    cap = max(_LANE, (budget_bytes // bytes_per_lane) // _LANE * _LANE)
    tile = _LANE
    for t in range(_LANE, m_pad + 1, _LANE):
        if m_pad % t == 0 and t <= cap:
            tile = t
    return tile


def _pallas_spectral_mul(xr, xi, wr, wi, m_tile):
    """xr/xi: (B,Ci,Mpad) f32; wr/wi: (Ci,Co,Mpad) f32 -> two (B,Co,Mpad) f32."""
    B, Ci, Mp = xr.shape
    Co = wr.shape[1]
    assert Mp % m_tile == 0

    x_spec = pl.BlockSpec((B, Ci, m_tile), lambda m: (0, 0, m))
    w_spec = pl.BlockSpec((Ci, Co, m_tile), lambda m: (0, 0, m))
    o_spec = pl.BlockSpec((B, Co, m_tile), lambda m: (0, 0, m))

    block_bytes = 4 * m_tile * (2 * B * Ci + 2 * Ci * Co + 2 * B * Co)
    vmem_limit = int(min(max(3 * block_bytes, 16 << 20), 32 << 20))

    return pl.pallas_call(
        _spectral_mul_kernel,
        out_shape=(
            jax.ShapeDtypeStruct((B, Co, Mp), jnp.float32),
            jax.ShapeDtypeStruct((B, Co, Mp), jnp.float32),
        ),
        grid_spec=pltpu.PrefetchScalarGridSpec(
            num_scalar_prefetch=0,
            grid=(Mp // m_tile,),
            in_specs=[x_spec, x_spec, w_spec, w_spec],
            out_specs=[o_spec, o_spec],
        ),
        compiler_params=pltpu.CompilerParams(
            dimension_semantics=("parallel",),
            vmem_limit_bytes=vmem_limit,
        ),
    )(xr, xi, wr, wi)


class SpectralConv3d:
    """JAX / Pallas port of the PyTorch SpectralConv3d module."""

    def __init__(self, in_channels, out_channels, modes1, modes2, modes3, key):
        self.in_channels = in_channels
        self.out_channels = out_channels
        self.modes1 = modes1
        self.modes2 = modes2
        self.modes3 = modes3
        scale = 1.0 / (in_channels * out_channels)

        # torch.rand(..., dtype=torch.cfloat): real & imag ~ U[0,1), scaled.
        kr, ki = jax.random.split(key)
        shape = (4, in_channels, out_channels, modes1, modes2, modes3)
        w_real = scale * jax.random.uniform(kr, shape, dtype=jnp.float32)
        w_imag = scale * jax.random.uniform(ki, shape, dtype=jnp.float32)
        # complex form (weights1..4 stacked) kept for the reference check
        self.weights = (w_real + 1j * w_imag).astype(jnp.complex64)

        # Pre-compute the kernel layout ONCE: (Ci, Co, 4*M) with the mode axis
        # (corner-major) last, padded to a multiple of 128 lanes.
        M = modes1 * modes2 * modes3
        self._m_total = 4 * M
        self._m_pad = _round_up(self._m_total, _LANE)
        pad = self._m_pad - self._m_total

        def to_kernel_layout(w):
            w = w.reshape(4, in_channels, out_channels, M)          # (4,Ci,Co,M)
            w = jnp.moveaxis(w, 0, 2).reshape(in_channels, out_channels, 4 * M)
            return jnp.pad(w, ((0, 0), (0, 0), (0, pad)))

        self._w_real = to_kernel_layout(w_real)
        self._w_imag = to_kernel_layout(w_imag)

    def __call__(self, x):
        B = x.shape[0]
        D1, D2, D3 = x.shape[-3], x.shape[-2], x.shape[-1]
        m1, m2, m3 = self.modes1, self.modes2, self.modes3
        Ci, Co = self.in_channels, self.out_channels
        M = m1 * m2 * m3
        assert m1 <= D1 and m2 <= D2 and m3 <= D3 // 2 + 1, "modes exceed spectrum"

        # TODO(synk): rfftn/irfftn have no clean Pallas equivalent; stay as jnp.fft.
        x_ft = jnp.fft.rfftn(x.astype(jnp.float32), axes=(-3, -2, -1))

        # Gather the 4 low/high frequency corner blocks and lay the flattened
        # mode axis last (contiguous reshapes, no transposes): (B, Ci, 4*M).
        corners = [
            x_ft[:, :, :m1, :m2, :m3],
            x_ft[:, :, -m1:, :m2, :m3],
            x_ft[:, :, :m1, -m2:, :m3],
            x_ft[:, :, -m1:, -m2:, :m3],
        ]
        xc = jnp.concatenate([c.reshape(B, Ci, M) for c in corners], axis=-1)
        xc = jnp.pad(xc, ((0, 0), (0, 0), (0, self._m_pad - self._m_total)))

        m_tile = _choose_mode_tile(self._m_pad, B, Ci, Co)
        out_r, out_i = _pallas_spectral_mul(
            jnp.real(xc).astype(jnp.float32),
            jnp.imag(xc).astype(jnp.float32),
            self._w_real,
            self._w_imag,
            m_tile,
        )

        out_c = (out_r + 1j * out_i)[:, :, : self._m_total].astype(jnp.complex64)
        out_c = out_c.reshape(B, Co, 4, m1, m2, m3)

        # Scatter corners into the (otherwise zero) spectral output tensor.
        out_ft = jnp.zeros((B, Co, D1, D2, D3 // 2 + 1), dtype=jnp.complex64)
        out_ft = out_ft.at[:, :, :m1, :m2, :m3].set(out_c[:, :, 0])
        out_ft = out_ft.at[:, :, -m1:, :m2, :m3].set(out_c[:, :, 1])
        out_ft = out_ft.at[:, :, :m1, -m2:, :m3].set(out_c[:, :, 2])
        out_ft = out_ft.at[:, :, -m1:, -m2:, :m3].set(out_c[:, :, 3])

        return jnp.fft.irfftn(out_ft, s=(D1, D2, D3), axes=(-3, -2, -1))


def _reference_forward(x, weights, m1, m2, m3, Co):
    """Pure-JAX reference mirroring the PyTorch forward exactly."""
    B = x.shape[0]
    D1, D2, D3 = x.shape[-3], x.shape[-2], x.shape[-1]
    x_ft = jnp.fft.rfftn(x.astype(jnp.float32), axes=(-3, -2, -1))
    mul = lambda a, w: jnp.einsum("bixyz,ioxyz->boxyz", a, w)
    out_ft = jnp.zeros((B, Co, D1, D2, D3 // 2 + 1), dtype=jnp.complex64)
    out_ft = out_ft.at[:, :, :m1, :m2, :m3].set(mul(x_ft[:, :, :m1, :m2, :m3], weights[0]))
    out_ft = out_ft.at[:, :, -m1:, :m2, :m3].set(mul(x_ft[:, :, -m1:, :m2, :m3], weights[1]))
    out_ft = out_ft.at[:, :, :m1, -m2:, :m3].set(mul(x_ft[:, :, :m1, -m2:, :m3], weights[2]))
    out_ft = out_ft.at[:, :, -m1:, -m2:, :m3].set(mul(x_ft[:, :, -m1:, -m2:, :m3], weights[3]))
    return jnp.fft.irfftn(out_ft, s=(D1, D2, D3), axes=(-3, -2, -1))


if __name__ == "__main__":
    key = jax.random.PRNGKey(0)
    k_x, k_w = jax.random.split(key)

    B, Cin, Cout = 2, 4, 6
    D1 = D2 = D3 = 16
    m1 = m2 = m3 = 6          # 4*M = 864 -> padded to 896 lanes

    layer = SpectralConv3d(Cin, Cout, m1, m2, m3, k_w)
    x = jax.random.normal(k_x, (B, Cin, D1, D2, D3), dtype=jnp.float32)

    out = jax.jit(layer.__call__)(x)
    out = jax.block_until_ready(out)

    ref = _reference_forward(x, layer.weights, m1, m2, m3, Cout)
    assert out.shape == (B, Cout, D1, D2, D3), out.shape
    assert jnp.allclose(out, ref, atol=1e-4, rtol=1e-4), "mismatch vs reference"

    print("KERNEL_OK")
</pallas_src>

<mosaic_0001>
module attributes {stable_mosaic.version = 11 : i64} {
  func.func @_spectral_mul_kernel(%arg0: i32, %arg1: memref<2x4x896xf32, #tpu.memory_space<vmem>>, %arg2: memref<2x4x896xf32, #tpu.memory_space<vmem>>, %arg3: memref<4x6x896xf32, #tpu.memory_space<vmem>>, %arg4: memref<4x6x896xf32, #tpu.memory_space<vmem>>, %arg5: memref<2x6x896xf32, #tpu.memory_space<vmem>>, %arg6: memref<2x6x896xf32, #tpu.memory_space<vmem>>) attributes {dimension_semantics = [#tpu.dimension_semantics<parallel>], iteration_bounds = array<i64: 1>, scalar_prefetch = 0 : i64, scratch_operands = 0 : i64, tpu.core_type = #tpu.core_type<tc>, window_params = [{transform_indices = @transform_0, window_bounds = array<i64: 2, 4, 896>}, {transform_indices = @transform_1, window_bounds = array<i64: 2, 4, 896>}, {transform_indices = @transform_2, window_bounds = array<i64: 4, 6, 896>}, {transform_indices = @transform_3, window_bounds = array<i64: 4, 6, 896>}, {transform_indices = @transform_4, window_bounds = array<i64: 2, 6, 896>}, {transform_indices = @transform_5, window_bounds = array<i64: 2, 6, 896>}]} {
    %c0 = arith.constant 0 : index
    %c0_0 = arith.constant 0 : index
    %c0_1 = arith.constant 0 : index
    %0 = vector.load %arg1[%c0, %c0_0, %c0_1] : memref<2x4x896xf32, #tpu.memory_space<vmem>>, vector<2x4x896xf32>
    %c0_2 = arith.constant 0 : index
    %c0_3 = arith.constant 0 : index
    %c0_4 = arith.constant 0 : index
    %1 = vector.load %arg2[%c0_2, %c0_3, %c0_4] : memref<2x4x896xf32, #tpu.memory_space<vmem>>, vector<2x4x896xf32>
    %c0_5 = arith.constant 0 : index
    %c0_6 = arith.constant 0 : index
    %c0_7 = arith.constant 0 : index
    %2 = vector.load %arg3[%c0_5, %c0_6, %c0_7] : memref<4x6x896xf32, #tpu.memory_space<vmem>>, vector<4x6x896xf32>
    %c0_8 = arith.constant 0 : index
    %c0_9 = arith.constant 0 : index
    %c0_10 = arith.constant 0 : index
    %3 = vector.load %arg4[%c0_8, %c0_9, %c0_10] : memref<4x6x896xf32, #tpu.memory_space<vmem>>, vector<4x6x896xf32>
    %4 = vector.extract_strided_slice %0 {offsets = [0, 0, 0], sizes = [2, 1, 896], strides = [1, 1, 1]} : vector<2x4x896xf32> to vector<2x1x896xf32>
    %5 = vector.extract_strided_slice %1 {offsets = [0, 0, 0], sizes = [2, 1, 896], strides = [1, 1, 1]} : vector<2x4x896xf32> to vector<2x1x896xf32>
    %6 = vector.extract_strided_slice %2 {offsets = [0, 0, 0], sizes = [1, 6, 896], strides = [1, 1, 1]} : vector<4x6x896xf32> to vector<1x6x896xf32>
    %7 = vector.shape_cast %6 : vector<1x6x896xf32> to vector<6x896xf32>
    %8 = vector.shape_cast %7 : vector<6x896xf32> to vector<1x6x896xf32>
    %9 = vector.extract_strided_slice %3 {offsets = [0, 0, 0], sizes = [1, 6, 896], strides = [1, 1, 1]} : vector<4x6x896xf32> to vector<1x6x896xf32>
    %10 = vector.shape_cast %9 : vector<1x6x896xf32> to vector<6x896xf32>
    %11 = vector.shape_cast %10 : vector<6x896xf32> to vector<1x6x896xf32>
    %12 = vector.broadcast %4 : vector<2x1x896xf32> to vector<2x6x896xf32>
    %13 = vector.broadcast %8 : vector<1x6x896xf32> to vector<2x6x896xf32>
    %14 = arith.mulf %12, %13 : vector<2x6x896xf32>
    %15 = vector.broadcast %5 : vector<2x1x896xf32> to vector<2x6x896xf32>
    %16 = vector.broadcast %11 : vector<1x6x896xf32> to vector<2x6x896xf32>
    %17 = arith.mulf %15, %16 : vector<2x6x896xf32>
    %18 = arith.subf %14, %17 : vector<2x6x896xf32>
    %19 = vector.broadcast %4 : vector<2x1x896xf32> to vector<2x6x896xf32>
    %20 = vector.broadcast %11 : vector<1x6x896xf32> to vector<2x6x896xf32>
    %21 = arith.mulf %19, %20 : vector<2x6x896xf32>
    %22 = vector.broadcast %5 : vector<2x1x896xf32> to vector<2x6x896xf32>
    %23 = vector.broadcast %8 : vector<1x6x896xf32> to vector<2x6x896xf32>
    %24 = arith.mulf %22, %23 : vector<2x6x896xf32>
    %25 = arith.addf %21, %24 : vector<2x6x896xf32>
    %26 = vector.extract_strided_slice %0 {offsets = [0, 1, 0], sizes = [2, 1, 896], strides = [1, 1, 1]} : vector<2x4x896xf32> to vector<2x1x896xf32>
    %27 = vector.extract_strided_slice %1 {offsets = [0, 1, 0], sizes = [2, 1, 896], strides = [1, 1, 1]} : vector<2x4x896xf32> to vector<2x1x896xf32>
    %28 = vector.extract_strided_slice %2 {offsets = [1, 0, 0], sizes = [1, 6, 896], strides = [1, 1, 1]} : vector<4x6x896xf32> to vector<1x6x896xf32>
    %29 = vector.shape_cast %28 : vector<1x6x896xf32> to vector<6x896xf32>
    %30 = vector.shape_cast %29 : vector<6x896xf32> to vector<1x6x896xf32>
    %31 = vector.extract_strided_slice %3 {offsets = [1, 0, 0], sizes = [1, 6, 896], strides = [1, 1, 1]} : vector<4x6x896xf32> to vector<1x6x896xf32>
    %32 = vector.shape_cast %31 : vector<1x6x896xf32> to vector<6x896xf32>
    %33 = vector.shape_cast %32 : vector<6x896xf32> to vector<1x6x896xf32>
    %34 = vector.broadcast %26 : vector<2x1x896xf32> to vector<2x6x896xf32>
    %35 = vector.broadcast %30 : vector<1x6x896xf32> to vector<2x6x896xf32>
    %36 = arith.mulf %34, %35 : vector<2x6x896xf32>
    %37 = vector.broadcast %27 : vector<2x1x896xf32> to vector<2x6x896xf32>
    %38 = vector.broadcast %33 : vector<1x6x896xf32> to vector<2x6x896xf32>
    %39 = arith.mulf %37, %38 : vector<2x6x896xf32>
    %40 = arith.subf %36, %39 : vector<2x6x896xf32>
    %41 = vector.broadcast %26 : vector<2x1x896xf32> to vector<2x6x896xf32>
    %42 = vector.broadcast %33 : vector<1x6x896xf32> to vector<2x6x896xf32>
    %43 = arith.mulf %41, %42 : vector<2x6x896xf32>
    %44 = vector.broadcast %27 : vector<2x1x896xf32> to vector<2x6x896xf32>
    %45 = vector.broadcast %30 : vector<1x6x896xf32> to vector<2x6x896xf32>
    %46 = arith.mulf %44, %45 : vector<2x6x896xf32>
    %47 = arith.addf %43, %46 : vector<2x6x896xf32>
    %48 = arith.addf %18, %40 : vector<2x6x896xf32>
    %49 = arith.addf %25, %47 : vector<2x6x896xf32>
    %50 = vector.extract_strided_slice %0 {offsets = [0, 2, 0], sizes = [2, 1, 896], strides = [1, 1, 1]} : vector<2x4x896xf32> to vector<2x1x896xf32>
    %51 = vector.extract_strided_slice %1 {offsets = [0, 2, 0], sizes = [2, 1, 896], strides = [1, 1, 1]} : vector<2x4x896xf32> to vector<2x1x896xf32>
    %52 = vector.extract_strided_slice %2 {offsets = [2, 0, 0], sizes = [1, 6, 896], strides = [1, 1, 1]} : vector<4x6x896xf32> to vector<1x6x896xf32>
    %53 = vector.shape_cast %52 : vector<1x6x896xf32> to vector<6x896xf32>
    %54 = vector.shape_cast %53 : vector<6x896xf32> to vector<1x6x896xf32>
    %55 = vector.extract_strided_slice %3 {offsets = [2, 0, 0], sizes = [1, 6, 896], strides = [1, 1, 1]} : vector<4x6x896xf32> to vector<1x6x896xf32>
    %56 = vector.shape_cast %55 : vector<1x6x896xf32> to vector<6x896xf32>
    %57 = vector.shape_cast %56 : vector<6x896xf32> to vector<1x6x896xf32>
    %58 = vector.broadcast %50 : vector<2x1x896xf32> to vector<2x6x896xf32>
    %59 = vector.broadcast %54 : vector<1x6x896xf32> to vector<2x6x896xf32>
    %60 = arith.mulf %58, %59 : vector<2x6x896xf32>
    %61 = vector.broadcast %51 : vector<2x1x896xf32> to vector<2x6x896xf32>
    %62 = vector.broadcast %57 : vector<1x6x896xf32> to vector<2x6x896xf32>
    %63 = arith.mulf %61, %62 : vector<2x6x896xf32>
    %64 = arith.subf %60, %63 : vector<2x6x896xf32>
    %65 = vector.broadcast %50 : vector<2x1x896xf32> to vector<2x6x896xf32>
    %66 = vector.broadcast %57 : vector<1x6x896xf32> to vector<2x6x896xf32>
    %67 = arith.mulf %65, %66 : vector<2x6x896xf32>
    %68 = vector.broadcast %51 : vector<2x1x896xf32> to vector<2x6x896xf32>
    %69 = vector.broadcast %54 : vector<1x6x896xf32> to vector<2x6x896xf32>
    %70 = arith.mulf %68, %69 : vector<2x6x896xf32>
    %71 = arith.addf %67, %70 : vector<2x6x896xf32>
    %72 = arith.addf %48, %64 : vector<2x6x896xf32>
    %73 = arith.addf %49, %71 : vector<2x6x896xf32>
    %74 = vector.extract_strided_slice %0 {offsets = [0, 3, 0], sizes = [2, 1, 896], strides = [1, 1, 1]} : vector<2x4x896xf32> to vector<2x1x896xf32>
    %75 = vector.extract_strided_slice %1 {offsets = [0, 3, 0], sizes = [2, 1, 896], strides = [1, 1, 1]} : vector<2x4x896xf32> to vector<2x1x896xf32>
    %76 = vector.extract_strided_slice %2 {offsets = [3, 0, 0], sizes = [1, 6, 896], strides = [1, 1, 1]} : vector<4x6x896xf32> to vector<1x6x896xf32>
    %77 = vector.shape_cast %76 : vector<1x6x896xf32> to vector<6x896xf32>
    %78 = vector.shape_cast %77 : vector<6x896xf32> to vector<1x6x896xf32>
    %79 = vector.extract_strided_slice %3 {offsets = [3, 0, 0], sizes = [1, 6, 896], strides = [1, 1, 1]} : vector<4x6x896xf32> to vector<1x6x896xf32>
    %80 = vector.shape_cast %79 : vector<1x6x896xf32> to vector<6x896xf32>
    %81 = vector.shape_cast %80 : vector<6x896xf32> to vector<1x6x896xf32>
    %82 = vector.broadcast %74 : vector<2x1x896xf32> to vector<2x6x896xf32>
    %83 = vector.broadcast %78 : vector<1x6x896xf32> to vector<2x6x896xf32>
    %84 = arith.mulf %82, %83 : vector<2x6x896xf32>
    %85 = vector.broadcast %75 : vector<2x1x896xf32> to vector<2x6x896xf32>
    %86 = vector.broadcast %81 : vector<1x6x896xf32> to vector<2x6x896xf32>
    %87 = arith.mulf %85, %86 : vector<2x6x896xf32>
    %88 = arith.subf %84, %87 : vector<2x6x896xf32>
    %89 = vector.broadcast %74 : vector<2x1x896xf32> to vector<2x6x896xf32>
    %90 = vector.broadcast %81 : vector<1x6x896xf32> to vector<2x6x896xf32>
    %91 = arith.mulf %89, %90 : vector<2x6x896xf32>
    %92 = vector.broadcast %75 : vector<2x1x896xf32> to vector<2x6x896xf32>
    %93 = vector.broadcast %78 : vector<1x6x896xf32> to vector<2x6x896xf32>
    %94 = arith.mulf %92, %93 : vector<2x6x896xf32>
    %95 = arith.addf %91, %94 : vector<2x6x896xf32>
    %96 = arith.addf %72, %88 : vector<2x6x896xf32>
    %97 = arith.addf %73, %95 : vector<2x6x896xf32>
    %c0_11 = arith.constant 0 : index
    %c0_12 = arith.constant 0 : index
    %c0_13 = arith.constant 0 : index
    %98 = vector.load %arg5[%c0_11, %c0_12, %c0_13] : memref<2x6x896xf32, #tpu.memory_space<vmem>>, vector<2x6x896xf32>
    tpu.vector_store %arg5[%c0_11, %c0_12, %c0_13], %96 {strides = array<i32>} : memref<2x6x896xf32, #tpu.memory_space<vmem>>, vector<2x6x896xf32>,
    %c0_14 = arith.constant 0 : index
    %c0_15 = arith.constant 0 : index
    %c0_16 = arith.constant 0 : index
    %99 = vector.load %arg6[%c0_14, %c0_15, %c0_16] : memref<2x6x896xf32, #tpu.memory_space<vmem>>, vector<2x6x896xf32>
    tpu.vector_store %arg6[%c0_14, %c0_15, %c0_16], %97 {strides = array<i32>} : memref<2x6x896xf32, #tpu.memory_space<vmem>>, vector<2x6x896xf32>,
    return
  }
  func.func @transform_0(%arg0: i32) -> (i32, i32, i32) {
    %c0_i32 = arith.constant 0 : i32
    %c0_i32_0 = arith.constant 0 : i32
    %c0_i32_1 = arith.constant 0 : i32
    return %c0_i32, %c0_i32_0, %arg0 : i32, i32, i32
  }
  func.func @transform_1(%arg0: i32) -> (i32, i32, i32) {
    %c0_i32 = arith.constant 0 : i32
    %c0_i32_0 = arith.constant 0 : i32
    %c0_i32_1 = arith.constant 0 : i32
    return %c0_i32, %c0_i32_0, %arg0 : i32, i32, i32
  }
  func.func @transform_2(%arg0: i32) -> (i32, i32, i32) {
    %c0_i32 = arith.constant 0 : i32
    %c0_i32_0 = arith.constant 0 : i32
    %c0_i32_1 = arith.constant 0 : i32
    return %c0_i32, %c0_i32_0, %arg0 : i32, i32, i32
  }
  func.func @transform_3(%arg0: i32) -> (i32, i32, i32) {
    %c0_i32 = arith.constant 0 : i32
    %c0_i32_0 = arith.constant 0 : i32
    %c0_i32_1 = arith.constant 0 : i32
    return %c0_i32, %c0_i32_0, %arg0 : i32, i32, i32
  }
  func.func @transform_4(%arg0: i32) -> (i32, i32, i32) {
    %c0_i32 = arith.constant 0 : i32
    %c0_i32_0 = arith.constant 0 : i32
    %c0_i32_1 = arith.constant 0 : i32
    return %c0_i32, %c0_i32_0, %arg0 : i32, i32, i32
  }
  func.func @transform_5(%arg0: i32) -> (i32, i32, i32) {
    %c0_i32 = arith.constant 0 : i32
    %c0_i32_0 = arith.constant 0 : i32
    %c0_i32_1 = arith.constant 0 : i32
    return %c0_i32, %c0_i32_0, %arg0 : i32, i32, i32
  }
}

</mosaic_0001>

<bundles_post_ra>
// kernel: a_call__.1
= control target key start
LH: loop header
LB: loop body
LE: loop exit
PB: predicated region body
PF: predicated region fallthrough
CT: control target
= control target key end

     0   :  { %v99_v0 = vlaneseq  ;;  %s3180_s0 = inlined_call_operand.vmem [shape: f32[2,4,896], index: 0, kind: input, shape index: {}]   ;;  %s3181_s1 = inlined_call_operand.vmem [shape: f32[2,4,896], index: 1, kind: input, shape index: {}]   ;;  %s3182_s2 = inlined_call_operand.vmem [shape: f32[4,6,896], index: 2, kind: input, shape index: {}]   ;;  %s3183_s3 = inlined_call_operand.vmem [shape: f32[4,6,896], index: 3, kind: input, shape index: {}]   ;;  %s3184_s4 = inlined_call_operand.vmem [shape: f32[2,6,896], index: 4, kind: output, shape index: {0}]   ;;  %s3185_s5 = inlined_call_operand.vmem [shape: f32[2,6,896], index: 5, kind: output, shape index: {1}]  }
   0x1   :  { %v1644_v2 = vld [vmem:[%s3180_s0] sm:$0xff]  ;;  %v1667_v9 = vld [vmem:[%s3182_s2 + $0x38] sm:$0x3f]  ;;  %v1680_v14 = vld [vmem:[%s3182_s2 + $0x70] sm:$0x3f] }
   0x2   :  { %v100_v1 = vshrl.u32 %v99_v0, 7  ;;  %v1649_v3 = vld [vmem:[%s3181_s1] sm:$0xff]  ;;  %v1690_v16 = vld [vmem:[%s3183_s3 + $0x38] sm:$0x3f]  ;;  %v1703_v21 = vld [vmem:[%s3182_s2 + $0xa8] sm:$0x3f] }
   0x3   :  { %v1662_v8 = vld [vmem:[%s3182_s2] sm:$0x3f]  ;;  %v1708_v22 = vld [vmem:[%s3183_s3 + $0x70] sm:$0x3f]  ;;  %v1713_v23 = vld [vmem:[%s3183_s3 + $0xa8] sm:$0x3f] }
   0x4   :  { %v1651_v4 = vsub.s32 0, %v100_v1  ;;  %v1653_v5 = vsub.s32 1, %v100_v1  ;;  %v1655_v6 = vsub.s32 2, %v100_v1  ;;  %v1657_v7 = vsub.s32 3, %v100_v1  ;;  %v1685_v15 = vld [vmem:[%s3183_s3] sm:$0x3f] }
   0x5   :  { %v1755_v42 = vsub.s32 4, %v100_v1  ;;  %v1757_v43 = vsub.s32 5, %v100_v1  ;;  %v1759_v46 = vsub.s32 6, %v100_v1  ;;  %v1761_v47 = vsub.s32 7, %v100_v1  ;;  %v1766_v49 = vld [vmem:[%s3182_s2 + $0x8] sm:$0x3f] }
   0x6   :  { %v102_v10 = vrot.slane %v1644_v2, %v1651_v4  ;;  %v250_v11 = vrot.slane %v1649_v3, %v1651_v4  ;;  %v446_v12 = vrot.slane %v1644_v2, %v1653_v5  ;;  %v586_v13 = vrot.slane %v1649_v3, %v1653_v5  ;;  %v1777_v53 = vld [vmem:[%s3182_s2 + $0x40] sm:$0x3f]  ;;  %v1782_v54 = vld [vmem:[%s3182_s2 + $0x78] sm:$0x3f]  ;;  %v1787_v55 = vld [vmem:[%s3183_s3 + $0x8] sm:$0x3f] }
   0x7   :  { %v810_v17 = vrot.slane %v1644_v2, %v1655_v6  ;;  %v950_v18 = vrot.slane %v1649_v3, %v1655_v6  ;;  %v1174_v19 = vrot.slane %v1644_v2, %v1657_v7  ;;  %v1314_v20 = vrot.slane %v1649_v3, %v1657_v7  ;;  %v1800_v61 = vld [vmem:[%s3182_s2 + $0xb0] sm:$0x3f]  ;;  %v1805_v62 = vld [vmem:[%s3183_s3 + $0x40] sm:$0x3f]  ;;  %v1810_v63 = vld [vmem:[%s3183_s3 + $0x78] sm:$0x3f] }
   0x8   :  { %v1716_v24 = vrot.slane %v102_v10, %v1651_v4  ;;  %v1719_v25 = vrot.slane %v250_v11, %v1651_v4  ;;  %v1722_v26 = vrot.slane %v446_v12, %v1653_v5  ;;  %v1725_v27 = vrot.slane %v586_v13, %v1653_v5 }
   0x9   :  { %v1728_v28 = vrot.slane %v810_v17, %v1655_v6  ;;  %v1731_v29 = vrot.slane %v950_v18, %v1655_v6  ;;  %v1734_v30 = vrot.slane %v1174_v19, %v1657_v7  ;;  %v1737_v31 = vrot.slane %v1314_v20, %v1657_v7  ;;  %v1836_v17 = vld [vmem:[%s3180_s0 + $0x8] sm:$0xff] }
   0xa   :  { %3341 = vst [vmem:[#allocation2_spill] sm:$0xff] %v1716_v24  ;;  %3342 = vst [vmem:[#allocation3_spill] sm:$0xff] %v1719_v25  ;;  %v225_v32 = vmul.f32 %v1716_v24, %v1662_v8  ;;  %v373_v33 = vmul.f32 %v1719_v25, %v1685_v15  ;;  %v569_v34 = vmul.f32 %v1722_v26, %v1667_v9  ;;  %v1841_v18 = vld [vmem:[%s3181_s1 + $0x8] sm:$0xff] }
   0xb   :  { %3343 = vst [vmem:[#allocation4_spill] sm:$0xff] %v1722_v26  ;;  %3344 = vst [vmem:[#allocation5_spill] sm:$0xff] %v1725_v27  ;;  %v709_v35 = vmul.f32 %v1725_v27, %v1690_v16  ;;  %v933_v36 = vmul.f32 %v1728_v28, %v1680_v14  ;;  %v1073_v37 = vmul.f32 %v1731_v29, %v1708_v22  ;;  %v2127_v26 = vld [vmem:[%s3182_s2 + $0x90] sm:$0x3f]  ;;  %v2157_v24 = vld [vmem:[%s3183_s3 + $0xc8] sm:$0x3f] }
   0xc   :  { %3345 = vst [vmem:[#allocation6_spill] sm:$0xff] %v1728_v28  ;;  %3346 = vst [vmem:[#allocation7_spill] sm:$0xff] %v1731_v29  ;;  %v1297_v38 = vmul.f32 %v1734_v30, %v1703_v21  ;;  %v1437_v39 = vmul.f32 %v1737_v31, %v1713_v23  ;;  %v387_v40 = vsub.f32 %v225_v32, %v373_v33 }
   0xd   :  { %3347 = vst [vmem:[#allocation8_spill] sm:$0xff] %v1734_v30  ;;  %3348 = vst [vmem:[#allocation9_spill] sm:$0xff] %v1737_v31  ;;  %v723_v41 = vsub.f32 %v569_v34, %v709_v35  ;;  %v1087_v44 = vsub.f32 %v933_v36, %v1073_v37  ;;  %v106_v50 = vrot.slane %v1644_v2, %v1755_v42 }
   0xe   :  { %v1451_v45 = vsub.f32 %v1297_v38, %v1437_v39  ;;  %v254_v51 = vrot.slane %v1649_v3, %v1755_v42  ;;  %v450_v52 = vrot.slane %v1644_v2, %v1757_v43  ;;  %v590_v56 = vrot.slane %v1649_v3, %v1757_v43  ;;  %3380 = vst [vmem:[#allocation41_spill] sm:$0xff] %v2127_v26 }
   0xf   :  { %v779_v48 = vadd.f32 %v723_v41, %v387_v40  ;;  %v814_v57 = vrot.slane %v1644_v2, %v1759_v46  ;;  %v954_v58 = vrot.slane %v1649_v3, %v1759_v46  ;;  %v1178_v59 = vrot.slane %v1644_v2, %v1761_v47  ;;  %3384 = vst [vmem:[#allocation45_spill] sm:$0xff] %v2157_v24 }
  0x10   :  { %v1813_v0 = vrot.slane %v106_v50, %v1651_v4  ;;  %v1816_v1 = vrot.slane %v254_v51, %v1651_v4  ;;  %v1819_v2 = vrot.slane %v450_v52, %v1653_v5  ;;  %v1822_v10 = vrot.slane %v590_v56, %v1653_v5  ;;  %v1874_v50 = vld [vmem:[%s3182_s2 + $0x10] sm:$0x3f] }
  0x11   :  { %v1143_v60 = vadd.f32 %v1087_v44, %v779_v48  ;;  %v1825_v11 = vrot.slane %v814_v57, %v1655_v6  ;;  %v1828_v12 = vrot.slane %v954_v58, %v1655_v6  ;;  %v1831_v13 = vrot.slane %v1178_v59, %v1657_v7  ;;  %v1869_v44 = vld [vmem:[%s3183_s3 + $0xb0] sm:$0x3f]  ;;  %v1891_v57 = vld [vmem:[%s3182_s2 + $0x48] sm:$0x3f] }
  0x12   :  { %3349 = vst [vmem:[#allocation10_spill] sm:$0xff] %v1813_v0  ;;  %3350 = vst [vmem:[#allocation11_spill] sm:$0xff] %v1816_v1  ;;  %v226_v20 = vmul.f32 %v1813_v0, %v1766_v49  ;;  %v374_v32 = vmul.f32 %v1816_v1, %v1787_v55  ;;  %v570_v33 = vmul.f32 %v1819_v2, %v1777_v53  ;;  %v1896_v58 = vld [vmem:[%s3183_s3 + $0x48] sm:$0x3f] }
  0x13   :  { %3351 = vst [vmem:[#allocation12_spill] sm:$0xff] %v1819_v2  ;;  %3352 = vst [vmem:[#allocation13_spill] sm:$0xff] %v1822_v10  ;;  %v1507_v19 = vadd.f32 %v1451_v45, %v1143_v60  ;;  %v710_v34 = vmul.f32 %v1822_v10, %v1805_v62  ;;  %v934_v35 = vmul.f32 %v1825_v11, %v1782_v54  ;;  %v2034_v2 = vld [vmem:[%s3183_s3 + $0x88] sm:$0x3f] }
  0x14   :  { %3353 = vst [vmem:[#allocation14_spill] sm:$0xff] %v1825_v11  ;;  %3354 = vst [vmem:[#allocation15_spill] sm:$0xff] %v1828_v12  ;;  %v1074_v36 = vmul.f32 %v1828_v12, %v1810_v63  ;;  %v1298_v37 = vmul.f32 %v1831_v13, %v1800_v61  ;;  %v388_v38 = vsub.f32 %v226_v20, %v374_v32  ;;  %v1909_v32 = vld [vmem:[%s3182_s2 + $0x80] sm:$0x3f] }
  0x15   :  { %3355 = vst [vmem:[#allocation16_spill] sm:$0xff] %v1831_v13  ;;  %1535 = vst [vmem:[%s3184_s4] sm:$0x3f] %v1507_v19  ;;  %v1318_v39 = vrot.slane %v1649_v3, %v1761_v47  ;;  %v110_v40 = vrot.slane %v1836_v17, %v1651_v4  ;;  %v258_v41 = vrot.slane %v1841_v18, %v1651_v4  ;;  %v1879_v3 = vld [vmem:[%s3183_s3 + $0x10] sm:$0x3f] }
  0x16   :  { %v724_v45 = vsub.f32 %v570_v33, %v710_v34  ;;  %v1088_v48 = vsub.f32 %v934_v35, %v1074_v36  ;;  %v454_v51 = vrot.slane %v1836_v17, %v1653_v5  ;;  %v594_v52 = vrot.slane %v1841_v18, %v1653_v5 }
  0x17   :  { %v1886_v56 = vrot.slane %v1318_v39, %v1657_v7  ;;  %v1899_v59 = vrot.slane %v110_v40, %v1651_v4  ;;  %v1902_v60 = vrot.slane %v258_v41, %v1651_v4  ;;  %v818_v19 = vrot.slane %v1836_v17, %v1655_v6 }
  0x18   :  { %v780_v20 = vadd.f32 %v724_v45, %v388_v38  ;;  %v1912_v33 = vrot.slane %v454_v51, %v1653_v5  ;;  %v1915_v34 = vrot.slane %v594_v52, %v1653_v5  ;;  %v958_v35 = vrot.slane %v1841_v18, %v1655_v6  ;;  %v1924_v38 = vld [vmem:[%s3183_s3 + $0x80] sm:$0x3f] }
  0x19   :  { %3356 = vst [vmem:[#allocation17_spill] sm:$0xff] %v1886_v56  ;;  %3357 = vst [vmem:[#allocation18_spill] sm:$0xff] %v1899_v59  ;;  %v1438_v36 = vmul.f32 %v1886_v56, %v1869_v44  ;;  %v227_v39 = vmul.f32 %v1899_v59, %v1874_v50  ;;  %v375_v40 = vmul.f32 %v1902_v60, %v1879_v3 }
  0x1a   :  { %3358 = vst [vmem:[#allocation19_spill] sm:$0xff] %v1902_v60  ;;  %3359 = vst [vmem:[#allocation20_spill] sm:$0xff] %v1912_v33  ;;  %v1931_v41 = vrot.slane %v818_v19, %v1655_v6  ;;  %v1144_v45 = vadd.f32 %v1088_v48, %v780_v20  ;;  %v571_v51 = vmul.f32 %v1912_v33, %v1891_v57  ;;  %v1947_v48 = vld [vmem:[%s3182_s2 + $0xb8] sm:$0x3f] }
  0x1b   :  { %3360 = vst [vmem:[#allocation21_spill] sm:$0xff] %v1915_v34  ;;  %v711_v52 = vmul.f32 %v1915_v34, %v1896_v58  ;;  %v1938_v56 = vrot.slane %v958_v35, %v1655_v6  ;;  %v1452_v13 = vsub.f32 %v1298_v37, %v1438_v36  ;;  %v389_v12 = vsub.f32 %v227_v39, %v375_v40  ;;  %v1958_v39 = vld [vmem:[%s3183_s3 + $0xb8] sm:$0x3f] }
  0x1c   :  { %3361 = vst [vmem:[#allocation22_spill] sm:$0xff] %v1931_v41  ;;  %v935_v59 = vmul.f32 %v1931_v41, %v1909_v32  ;;  %v1182_v60 = vrot.slane %v1836_v17, %v1657_v7  ;;  %v1322_v35 = vrot.slane %v1841_v18, %v1657_v7  ;;  %v114_v37 = vrot.slane %v1836_v17, %v1755_v42  ;;  %v1983_v34 = vld [vmem:[%s3183_s3 + $0x18] sm:$0x3f] }
  0x1d   :  { %3362 = vst [vmem:[#allocation23_spill] sm:$0xff] %v1938_v56  ;;  %v725_v19 = vsub.f32 %v571_v51, %v711_v52  ;;  %v1075_v20 = vmul.f32 %v1938_v56, %v1924_v38  ;;  %v1508_v36 = vadd.f32 %v1452_v13, %v1144_v45  ;;  %v1966_v51 = vld [vmem:[%s3182_s2 + $0x18] sm:$0x3f]  ;;  %v262_v52 = vrot.slane %v1841_v18, %v1755_v42 }
  0x1e   :  { %v1961_v40 = vrot.slane %v1182_v60, %v1657_v7  ;;  %v458_v56 = vrot.slane %v1836_v17, %v1757_v43  ;;  %v1973_v41 = vrot.slane %v1322_v35, %v1657_v7  ;;  %v1978_v60 = vld [vmem:[%s3182_s2 + $0x50] sm:$0x3f]  ;;  %v1986_v33 = vrot.slane %v114_v37, %v1651_v4 }
  0x1f   :  { %v781_v13 = vadd.f32 %v725_v19, %v389_v12  ;;  %v1089_v45 = vsub.f32 %v935_v59, %v1075_v20  ;;  %1536 = vst [vmem:[%s3184_s4 + $0x8] sm:$0x3f] %v1508_v36  ;;  %v1994_v59 = vrot.slane %v262_v52, %v1651_v4  ;;  %v598_v20 = vrot.slane %v1841_v18, %v1757_v43  ;;  %v2006_v36 = vld [vmem:[%s3183_s3 + $0x50] sm:$0x3f] }
  0x20   :  { %3363 = vst [vmem:[#allocation24_spill] sm:$0xff] %v1961_v40  ;;  %3364 = vst [vmem:[#allocation25_spill] sm:$0xff] %v1973_v41  ;;  %v1299_v12 = vmul.f32 %v1961_v40, %v1947_v48  ;;  %v1997_v19 = vrot.slane %v458_v56, %v1653_v5  ;;  %v1439_v37 = vmul.f32 %v1973_v41, %v1958_v39  ;;  %v2015_v56 = vld [vmem:[%s3180_s0 + $0x10] sm:$0xff] }
  0x21   :  { %3365 = vst [vmem:[#allocation26_spill] sm:$0xff] %v1986_v33  ;;  %3366 = vst [vmem:[#allocation27_spill] sm:$0xff] %v1994_v59  ;;  %v1145_v35 = vadd.f32 %v1089_v45, %v781_v13  ;;  %v228_v40 = vmul.f32 %v1986_v33, %v1966_v51  ;;  %v822_v52 = vrot.slane %v1836_v17, %v1759_v46  ;;  %v2020_v13 = vld [vmem:[%s3182_s2 + $0x88] sm:$0x3f] }
  0x22   :  { %3367 = vst [vmem:[#allocation28_spill] sm:$0xff] %v1997_v19  ;;  %v376_v45 = vmul.f32 %v1994_v59, %v1983_v34  ;;  %v572_v41 = vmul.f32 %v1997_v19, %v1978_v60  ;;  %v2027_v33 = vrot.slane %v598_v20, %v1653_v5  ;;  %v962_v11 = vrot.slane %v1841_v18, %v1759_v46  ;;  %v2046_v20 = vld [vmem:[%s3181_s1 + $0x10] sm:$0xff] }
  0x23   :  { %v1453_v10 = vsub.f32 %v1299_v12, %v1439_v37  ;;  %v2037_v1 = vrot.slane %v822_v52, %v1655_v6  ;;  %v1186_v59 = vrot.slane %v1836_v17, %v1761_v47  ;;  %v1326_v19 = vrot.slane %v1841_v18, %v1761_v47  ;;  %v2051_v12 = vld [vmem:[%s3182_s2 + $0xc0] sm:$0x3f] }
  0x24   :  { %3368 = vst [vmem:[#allocation29_spill] sm:$0xff] %v2027_v33  ;;  %v2056_v37 = vld [vmem:[%s3183_s3 + $0xc0] sm:$0x3f]  ;;  %v390_v52 = vsub.f32 %v228_v40, %v376_v45  ;;  %v712_v17 = vmul.f32 %v2027_v33, %v2006_v36  ;;  %v2061_v18 = vrot.slane %v962_v11, %v1655_v6  ;;  %v118_v0 = vrot.slane %v2015_v56, %v1651_v4 }
  0x25   :  { %3369 = vst [vmem:[#allocation30_spill] sm:$0xff] %v2037_v1  ;;  %v1509_v31 = vadd.f32 %v1453_v10, %v1145_v35  ;;  %v936_v30 = vmul.f32 %v2037_v1, %v2020_v13  ;;  %v2068_v29 = vrot.slane %v1186_v59, %v1657_v7  ;;  %v2071_v28 = vrot.slane %v1326_v19, %v1657_v7  ;;  %v2076_v40 = vld [vmem:[%s3182_s2 + $0x20] sm:$0x3f] }
  0x26   :  { %3370 = vst [vmem:[#allocation31_spill] sm:$0xff] %v2061_v18  ;;  %3373 = vst [vmem:[#allocation34_spill] sm:$0xff] %v2076_v40  ;;  %v726_v11 = vsub.f32 %v572_v41, %v712_v17  ;;  %v1076_v45 = vmul.f32 %v2061_v18, %v2034_v2  ;;  %v2081_v10 = vrot.slane %v118_v0, %v1651_v4  ;;  %v2095_v41 = vld [vmem:[%s3183_s3 + $0x20] sm:$0x3f] }
  0x27   :  { %3371 = vst [vmem:[#allocation32_spill] sm:$0xff] %v2068_v29  ;;  %3372 = vst [vmem:[#allocation33_spill] sm:$0xff] %v2071_v28  ;;  %v266_v35 = vrot.slane %v2046_v20, %v1651_v4  ;;  %v1300_v59 = vmul.f32 %v2068_v29, %v2051_v12  ;;  %v1440_v19 = vmul.f32 %v2071_v28, %v2056_v37  ;;  %v2109_v28 = vld [vmem:[%s3183_s3 + $0x58] sm:$0x3f] }
  0x28   :  { %3374 = vst [vmem:[#allocation35_spill] sm:$0xff] %v2081_v10  ;;  %1537 = vst [vmem:[%s3184_s4 + $0x10] sm:$0x3f] %v1509_v31  ;;  %v462_v0 = vrot.slane %v2015_v56, %v1653_v5  ;;  %v602_v17 = vrot.slane %v2046_v20, %v1653_v5  ;;  %v782_v18 = vadd.f32 %v726_v11, %v390_v52  ;;  %v2104_v31 = vld [vmem:[%s3182_s2 + $0x58] sm:$0x3f] }
  0x29   :  { %3375 = vst [vmem:[#allocation36_spill] sm:$0xff] %v2095_v41  ;;  %v1090_v1 = vsub.f32 %v936_v30, %v1076_v45  ;;  %3376 = vst [vmem:[#allocation37_spill] sm:$0xff] %v2109_v28  ;;  %v229_v29 = vmul.f32 %v2081_v10, %v2076_v40  ;;  %v2114_v33 = vrot.slane %v266_v35, %v1651_v4 }
  0x2a   :  { %v1454_v27 = vsub.f32 %v1300_v59, %v1440_v19  ;;  %v2117_v52 = vrot.slane %v462_v0, %v1653_v5  ;;  %v2120_v30 = vrot.slane %v602_v17, %v1653_v5  ;;  %v826_v11 = vrot.slane %v2015_v56, %v1655_v6  ;;  %v2138_v0 = vld [vmem:[%s3182_s2 + $0xc8] sm:$0x3f] }
  0x2b   :  { %3377 = vst [vmem:[#allocation38_spill] sm:$0xff] %v2114_v33  ;;  %v1146_v45 = vadd.f32 %v1090_v1, %v782_v18  ;;  %v377_v35 = vmul.f32 %v2114_v33, %v2095_v41  ;;  %v966_v59 = vrot.slane %v2046_v20, %v1655_v6  ;;  %v1190_v19 = vrot.slane %v2015_v56, %v1657_v7  ;;  %v2143_v1 = vld [vmem:[%s3183_s3 + $0x90] sm:$0x3f] }
  0x2c   :  { %3378 = vst [vmem:[#allocation39_spill] sm:$0xff] %v2117_v52  ;;  %3379 = vst [vmem:[#allocation40_spill] sm:$0xff] %v2120_v30  ;;  %v573_v18 = vmul.f32 %v2117_v52, %v2104_v31  ;;  %v713_v17 = vmul.f32 %v2120_v30, %v2109_v28  ;;  %v2150_v33 = vrot.slane %v826_v11, %v1655_v6 }
  0x2d   :  { %3381 = vst [vmem:[#allocation42_spill] sm:$0xff] %v2138_v0  ;;  %3382 = vst [vmem:[#allocation43_spill] sm:$0xff] %v2143_v1  ;;  %v1330_v10 = vrot.slane %v2046_v20, %v1657_v7  ;;  %v1510_v25 = vadd.f32 %v1454_v27, %v1146_v45  ;;  %v391_v41 = vsub.f32 %v229_v29, %v377_v35  ;;  %v2182_v35 = vld [vmem:[%s3182_s2 + $0x28] sm:$0x3f] }
  0x2e   :  { %3383 = vst [vmem:[#allocation44_spill] sm:$0xff] %v2150_v33  ;;  %v2160_v40 = vrot.slane %v966_v59, %v1655_v6  ;;  %v2163_v52 = vrot.slane %v1190_v19, %v1657_v7  ;;  %v727_v30 = vsub.f32 %v573_v18, %v713_v17  ;;  %v937_v11 = vmul.f32 %v2150_v33, %v2127_v26  ;;  %v2193_v18 = vld [vmem:[%s3182_s2 + $0x60] sm:$0x3f]  ;;  %v2198_v17 = vld [vmem:[%s3183_s3 + $0x28] sm:$0x3f] }
  0x2f   :  { %v2168_v28 = vrot.slane %v1330_v10, %v1657_v7  ;;  %v122_v27 = vrot.slane %v2015_v56, %v1755_v42  ;;  %1538 = vst [vmem:[%s3184_s4 + $0x18] sm:$0x3f] %v1510_v25  ;;  %3388 = vst [vmem:[#allocation49_spill] sm:$0xff] %v2182_v35  ;;  %v270_v10 = vrot.slane %v2046_v20, %v1755_v42 }
  0x30   :  { %3385 = vst [vmem:[#allocation46_spill] sm:$0xff] %v2160_v40  ;;  %3386 = vst [vmem:[#allocation47_spill] sm:$0xff] %v2163_v52  ;;  %v1077_v29 = vmul.f32 %v2160_v40, %v2143_v1  ;;  %v1301_v45 = vmul.f32 %v2163_v52, %v2138_v0  ;;  %v466_v59 = vrot.slane %v2015_v56, %v1757_v43  ;;  %v2221_v0 = vld [vmem:[%s3182_s2 + $0x98] sm:$0x3f] }
  0x31   :  { %3387 = vst [vmem:[#allocation48_spill] sm:$0xff] %v2168_v28  ;;  %v783_v19 = vadd.f32 %v727_v30, %v391_v41  ;;  %v1441_v25 = vmul.f32 %v2168_v28, %v2157_v24  ;;  %3389 = vst [vmem:[#allocation50_spill] sm:$0xff] %v2193_v18  ;;  %v2201_v52 = vrot.slane %v122_v27, %v1651_v4  ;;  %v2208_v30 = vld [vmem:[%s3183_s3 + $0x60] sm:$0x3f] }
  0x32   :  { %3390 = vst [vmem:[#allocation51_spill] sm:$0xff] %v2198_v17  ;;  %v606_v40 = vrot.slane %v2046_v20, %v1757_v43  ;;  %v1091_v41 = vsub.f32 %v937_v11, %v1077_v29  ;;  %3392 = vst [vmem:[#allocation53_spill] sm:$0xff] %v2208_v30  ;;  %v2211_v28 = vrot.slane %v270_v10, %v1651_v4 }
  0x33   :  { %3391 = vst [vmem:[#allocation52_spill] sm:$0xff] %v2201_v52  ;;  %v2214_v33 = vrot.slane %v466_v59, %v1653_v5  ;;  %v830_v24 = vrot.slane %v2015_v56, %v1759_v46  ;;  %v1455_v27 = vsub.f32 %v1301_v45, %v1441_v25  ;;  %3395 = vst [vmem:[#allocation56_spill] sm:$0xff] %v2221_v0  ;;  %v22_v59 = vld [vmem:[%s3180_s0 + $0x18] sm:$0xf] }
  0x34   :  { %3393 = vst [vmem:[#allocation54_spill] sm:$0xff] %v2211_v28  ;;  %v230_v11 = vmul.f32 %v2201_v52, %v2182_v35  ;;  %v2226_v29 = vrot.slane %v606_v40, %v1653_v5  ;;  %v970_v10 = vrot.slane %v2046_v20, %v1759_v46  ;;  %v1147_v1 = vadd.f32 %v1091_v41, %v783_v19  ;;  %v2236_v45 = vld [vmem:[%s3183_s3 + $0x98] sm:$0x3f] }
  0x35   :  { %3394 = vst [vmem:[#allocation55_spill] sm:$0xff] %v2214_v33  ;;  %3397 = vst [vmem:[#allocation58_spill] sm:$0xff] %v2236_v45  ;;  %v378_v25 = vmul.f32 %v2211_v28, %v2198_v17  ;;  %v574_v40 = vmul.f32 %v2214_v33, %v2193_v18  ;;  %v2243_v52 = vrot.slane %v830_v24, %v1655_v6  ;;  %v30_v28 = vld [vmem:[%s3181_s1 + $0x18] sm:$0xf]  ;;  %v2260_v24 = vld [vmem:[%s3182_s2 + $0xd0] sm:$0x3f] }
  0x36   :  { %3396 = vst [vmem:[#allocation57_spill] sm:$0xff] %v2226_v29  ;;  %v714_v35 = vmul.f32 %v2226_v29, %v2208_v30  ;;  %v2248_v26 = vrot.slane %v970_v10, %v1655_v6  ;;  %v1194_v19 = vrot.slane %v2015_v56, %v1761_v47  ;;  %v1334_v41 = vrot.slane %v2046_v20, %v1761_v47  ;;  %v2265_v10 = vld [vmem:[%s3183_s3 + $0xd0] sm:$0x3f] }
  0x37   :  { %3398 = vst [vmem:[#allocation59_spill] sm:$0xff] %v2243_v52  ;;  %v1511_v33 = vadd.f32 %v1455_v27, %v1147_v1  ;;  %3400 = vst [vmem:[#allocation61_spill] sm:$0xff] %v2260_v24  ;;  %v392_v29 = vsub.f32 %v230_v11, %v378_v25  ;;  %v938_v56 = vmul.f32 %v2243_v52, %v2221_v0  ;;  %v2281_v17 = vld [vmem:[%s3182_s2 + $0x30] sm:$0x3f]  ;;  %v2327_v0 = vld [vmem:[%s3180_s0 + $0x1c] sm:$0xff] }
  0x38   :  { %3399 = vst [vmem:[#allocation60_spill] sm:$0xff] %v2248_v26  ;;  %3401 = vst [vmem:[#allocation62_spill] sm:$0xff] %v2265_v10  ;;  %v126_v20 = vrot.slane %v22_v59, %v1651_v4  ;;  %v728_v30 = vsub.f32 %v574_v40, %v714_v35  ;;  %v1078_v1 = vmul.f32 %v2248_v26, %v2236_v45 }
  0x39   :  { %v2273_v27 = vrot.slane %v1194_v19, %v1657_v7  ;;  %v2276_v18 = vrot.slane %v1334_v41, %v1657_v7  ;;  %3404 = vst [vmem:[#allocation65_spill] sm:$0xff] %v2281_v17  ;;  %1539 = vst [vmem:[%s3184_s4 + $0x20] sm:$0x3f] %v1511_v33  ;;  %v274_v11 = vrot.slane %v30_v28, %v1651_v4  ;;  %v2299_v33 = vld [vmem:[%s3182_s2 + $0x68] sm:$0x3f] }
  0x3a   :  { %v2287_v35 = vrot.slane %v126_v20, %v1651_v4  ;;  %v470_v25 = vrot.slane %v22_v59, %v1653_v5  ;;  %v610_v40 = vrot.slane %v30_v28, %v1653_v5  ;;  %v784_v19 = vadd.f32 %v728_v30, %v392_v29  ;;  %3406 = vst [vmem:[#allocation67_spill] sm:$0xff] %v2299_v33  ;;  %v2304_v20 = vld [vmem:[%s3183_s3 + $0x30] sm:$0x3f]  ;;  %v2309_v30 = vld [vmem:[%s3183_s3 + $0x68] sm:$0x3f] }
  0x3b   :  { %3402 = vst [vmem:[#allocation63_spill] sm:$0xff] %v2273_v27  ;;  %3403 = vst [vmem:[#allocation64_spill] sm:$0xff] %v2276_v18  ;;  %v1092_v41 = vsub.f32 %v938_v56, %v1078_v1  ;;  %v1302_v26 = vmul.f32 %v2273_v27, %v2260_v24  ;;  %v1442_v52 = vmul.f32 %v2276_v18, %v2265_v10 }
  0x3c   :  { %3405 = vst [vmem:[#allocation66_spill] sm:$0xff] %v2287_v35  ;;  %3407 = vst [vmem:[#allocation68_spill] sm:$0xff] %v2309_v30  ;;  %v231_v29 = vmul.f32 %v2287_v35, %v2281_v17  ;;  %v2314_v56 = vrot.slane %v274_v11, %v1651_v4  ;;  %v2317_v1 = vrot.slane %v470_v25, %v1653_v5  ;;  %v2332_v11 = vld [vmem:[%s3182_s2 + $0xa0] sm:$0x3f]  ;;  %v2354_v17 = vld [vmem:[%s3182_s2 + $0xd8] sm:$0x3f] }
  0x3d   :  { %v2320_v18 = vrot.slane %v610_v40, %v1653_v5  ;;  %v1148_v27 = vadd.f32 %v1092_v41, %v784_v19  ;;  %v1456_v10 = vsub.f32 %v1302_v26, %v1442_v52  ;;  %v834_v24 = vrot.slane %v22_v59, %v1655_v6  ;;  %v2337_v25 = vld [vmem:[%s3183_s3 + $0xa0] sm:$0x3f] }
  0x3e   :  { %3408 = vst [vmem:[#allocation69_spill] sm:$0xff] %v2314_v56  ;;  %3409 = vst [vmem:[#allocation70_spill] sm:$0xff] %v2317_v1  ;;  %v974_v45 = vrot.slane %v30_v28, %v1655_v6  ;;  %v379_v26 = vmul.f32 %v2314_v56, %v2304_v20  ;;  %v575_v52 = vmul.f32 %v2317_v1, %v2299_v33  ;;  %v2349_v41 = vld [vmem:[%s3181_s1 + $0x1c] sm:$0xff] }
  0x3f   :  { %3410 = vst [vmem:[#allocation71_spill] sm:$0xff] %v2320_v18  ;;  %v715_v40 = vmul.f32 %v2320_v18, %v2309_v30  ;;  %v1198_v19 = vrot.slane %v22_v59, %v1657_v7  ;;  %v1512_v35 = vadd.f32 %v1456_v10, %v1148_v27  ;;  %v2357_v56 = vrot.slane %v834_v24, %v1655_v6  ;;  %v2366_v59 = vld [vmem:[%s3183_s3 + $0xd8] sm:$0x3f] }
  0x40   :  { %v2360_v1 = vrot.slane %v974_v45, %v1655_v6  ;;  %v1338_v18 = vrot.slane %v30_v28, %v1657_v7  ;;  %3413 = vst [vmem:[#allocation74_spill] sm:$0xff] %v2366_v59  ;;  %v393_v30 = vsub.f32 %v231_v29, %v379_v26  ;;  %v130_v33 = vrot.slane %v2327_v0, %v1651_v4 }
  0x41   :  { %3411 = vst [vmem:[#allocation72_spill] sm:$0xff] %v2357_v56  ;;  %v729_v10 = vsub.f32 %v575_v52, %v715_v40  ;;  %v2369_v27 = vrot.slane %v1198_v19, %v1657_v7  ;;  %1540 = vst [vmem:[%s3184_s4 + $0x28] sm:$0x3f] %v1512_v35  ;;  %v939_v28 = vmul.f32 %v2357_v56, %v2332_v11 }
  0x42   :  { %3412 = vst [vmem:[#allocation73_spill] sm:$0xff] %v2360_v1  ;;  %v1079_v45 = vmul.f32 %v2360_v1, %v2337_v25  ;;  %v2381_v24 = vrot.slane %v1338_v18, %v1657_v7  ;;  %v278_v29 = vrot.slane %v2349_v41, %v1651_v4  ;;  %v2388_v40 = vrot.slane %v130_v33, %v1651_v4 }
  0x43   :  { %3414 = vst [vmem:[#allocation75_spill] sm:$0xff] %v2369_v27  ;;  %v785_v26 = vadd.f32 %v729_v10, %v393_v30  ;;  %v1303_v52 = vmul.f32 %v2369_v27, %v2354_v17  ;;  %v474_v35 = vrot.slane %v2327_v0, %v1653_v5  ;;  %v614_v56 = vrot.slane %v2349_v41, %v1653_v5 }
  0x44   :  { %3415 = vst [vmem:[#allocation76_spill] sm:$0xff] %v2381_v24  ;;  %3416 = vst [vmem:[#allocation77_spill] sm:$0xff] %v2388_v40  ;;  %v1093_v19 = vsub.f32 %v939_v28, %v1079_v45  ;;  %v1443_v1 = vmul.f32 %v2381_v24, %v2366_v59  ;;  %v2395_v18 = vrot.slane %v278_v29, %v1651_v4 }
  0x45   :  { %v232_v30 = vmul.f32 %v2388_v40, %v1662_v8  ;;  %v2402_v10 = vrot.slane %v474_v35, %v1653_v5  ;;  %v838_v33 = vrot.slane %v2327_v0, %v1655_v6  ;;  %v978_v28 = vrot.slane %v2349_v41, %v1655_v6 }
  0x46   :  { %3417 = vst [vmem:[#allocation78_spill] sm:$0xff] %v2395_v18  ;;  %v1149_v45 = vadd.f32 %v1093_v19, %v785_v26  ;;  %v1457_v24 = vsub.f32 %v1303_v52, %v1443_v1  ;;  %v380_v29 = vmul.f32 %v2395_v18, %v1685_v15  ;;  %v2411_v27 = vrot.slane %v614_v56, %v1653_v5  ;;  %v3463_v18 = vld [vmem:[#allocation45_spill] sm:$0xff] }
  0x47   :  { %3418 = vst [vmem:[#allocation79_spill] sm:$0xff] %v2402_v10  ;;  %v576_v8 = vmul.f32 %v2402_v10, %v1667_v9  ;;  %v2416_v35 = vrot.slane %v838_v33, %v1655_v6  ;;  %v2419_v40 = vrot.slane %v978_v28, %v1655_v6  ;;  %v1202_v59 = vrot.slane %v2327_v0, %v1657_v7  ;;  %v3457_v10 = vld [vmem:[#allocation41_spill] sm:$0xff] }
  0x48   :  { %3419 = vst [vmem:[#allocation80_spill] sm:$0xff] %v2411_v27  ;;  %v1513_v26 = vadd.f32 %v1457_v24, %v1149_v45  ;;  %v394_v1 = vsub.f32 %v232_v30, %v380_v29  ;;  %v716_v52 = vmul.f32 %v2411_v27, %v1690_v16  ;;  %v1342_v56 = vrot.slane %v2349_v41, %v1657_v7 }
  0x49   :  { %3420 = vst [vmem:[#allocation81_spill] sm:$0xff] %v2416_v35  ;;  %3421 = vst [vmem:[#allocation82_spill] sm:$0xff] %v2419_v40  ;;  %v940_v9 = vmul.f32 %v2416_v35, %v1680_v14  ;;  %v1080_v19 = vmul.f32 %v2419_v40, %v1708_v22  ;;  %v2432_v33 = vrot.slane %v1202_v59, %v1657_v7 }
  0x4a   :  { %v134_v28 = vrot.slane %v2327_v0, %v1755_v42  ;;  %1541 = vst [vmem:[%s3184_s4 + $0x30] sm:$0x3f] %v1513_v26  ;;  %v730_v24 = vsub.f32 %v576_v8, %v716_v52  ;;  %v2440_v30 = vrot.slane %v1342_v56, %v1657_v7  ;;  %v282_v14 = vrot.slane %v2349_v41, %v1755_v42 }
  0x4b   :  { %3422 = vst [vmem:[#allocation83_spill] sm:$0xff] %v2432_v33  ;;  %v478_v45 = vrot.slane %v2327_v0, %v1757_v43  ;;  %v1094_v29 = vsub.f32 %v940_v9, %v1080_v19  ;;  %v1304_v59 = vmul.f32 %v2432_v33, %v1703_v21  ;;  %v618_v26 = vrot.slane %v2349_v41, %v1757_v43 }
  0x4c   :  { %3423 = vst [vmem:[#allocation84_spill] sm:$0xff] %v2440_v30  ;;  %v2449_v40 = vrot.slane %v134_v28, %v1651_v4  ;;  %v786_v8 = vadd.f32 %v730_v24, %v394_v1  ;;  %v1444_v52 = vmul.f32 %v2440_v30, %v1713_v23  ;;  %v2456_v56 = vrot.slane %v282_v14, %v1651_v4  ;;  %v2473_v23 = vld [vmem:[%s3180_s0 + $0x24] sm:$0xff] }
  0x4d   :  { %v2459_v35 = vrot.slane %v478_v45, %v1653_v5  ;;  %v2464_v21 = vrot.slane %v618_v26, %v1653_v5  ;;  %v842_v19 = vrot.slane %v2327_v0, %v1759_v46  ;;  %v982_v1 = vrot.slane %v2349_v41, %v1759_v46 }
  0x4e   :  { %3424 = vst [vmem:[#allocation85_spill] sm:$0xff] %v2449_v40  ;;  %3425 = vst [vmem:[#allocation86_spill] sm:$0xff] %v2456_v56  ;;  %v233_v9 = vmul.f32 %v2449_v40, %v1766_v49  ;;  %v1150_v28 = vadd.f32 %v1094_v29, %v786_v8  ;;  %v1458_v24 = vsub.f32 %v1304_v59, %v1444_v52  ;;  %v2492_v29 = vld [vmem:[%s3181_s1 + $0x24] sm:$0xff] }
  0x4f   :  { %3426 = vst [vmem:[#allocation87_spill] sm:$0xff] %v2459_v35  ;;  %3427 = vst [vmem:[#allocation88_spill] sm:$0xff] %v2464_v21  ;;  %v381_v14 = vmul.f32 %v2456_v56, %v1787_v55  ;;  %v577_v45 = vmul.f32 %v2459_v35, %v1777_v53  ;;  %v717_v26 = vmul.f32 %v2464_v21, %v1805_v62 }
  0x50   :  { %v2482_v40 = vrot.slane %v842_v19, %v1655_v6  ;;  %v2485_v30 = vrot.slane %v982_v1, %v1655_v6  ;;  %v1206_v33 = vrot.slane %v2327_v0, %v1761_v47  ;;  %v1514_v59 = vadd.f32 %v1458_v24, %v1150_v28 }
  0x51   :  { %v395_v8 = vsub.f32 %v233_v9, %v381_v14  ;;  %v1346_v52 = vrot.slane %v2349_v41, %v1761_v47  ;;  %v138_v19 = vrot.slane %v2473_v23, %v1651_v4  ;;  %v731_v21 = vsub.f32 %v577_v45, %v717_v26 }
  0x52   :  { %3428 = vst [vmem:[#allocation89_spill] sm:$0xff] %v2482_v40  ;;  %3429 = vst [vmem:[#allocation90_spill] sm:$0xff] %v2485_v30  ;;  %v941_v1 = vmul.f32 %v2482_v40, %v1782_v54  ;;  %v1081_v0 = vmul.f32 %v2485_v30, %v1810_v63  ;;  %v2503_v35 = vrot.slane %v1206_v33, %v1657_v7 }
  0x53   :  { %1542 = vst [vmem:[%s3184_s4 + $0x38] sm:$0x3f] %v1514_v59  ;;  %v2509_v9 = vrot.slane %v1346_v52, %v1657_v7  ;;  %v2512_v41 = vrot.slane %v138_v19, %v1651_v4  ;;  %v286_v28 = vrot.slane %v2492_v29, %v1651_v4  ;;  %v482_v24 = vrot.slane %v2473_v23, %v1653_v5 }
  0x54   :  { %3430 = vst [vmem:[#allocation91_spill] sm:$0xff] %v2503_v35  ;;  %v787_v14 = vadd.f32 %v731_v21, %v395_v8  ;;  %v1095_v45 = vsub.f32 %v941_v1, %v1081_v0  ;;  %v1305_v33 = vmul.f32 %v2503_v35, %v1800_v61  ;;  %v622_v26 = vrot.slane %v2492_v29, %v1653_v5 }
  0x55   :  { %3431 = vst [vmem:[#allocation92_spill] sm:$0xff] %v2509_v9  ;;  %3432 = vst [vmem:[#allocation93_spill] sm:$0xff] %v2512_v41  ;;  %v1445_v59 = vmul.f32 %v2509_v9, %v1869_v44  ;;  %v234_v52 = vmul.f32 %v2512_v41, %v1874_v50  ;;  %v2527_v19 = vrot.slane %v286_v28, %v1651_v4 }
  0x56   :  { %v2530_v30 = vrot.slane %v482_v24, %v1653_v5  ;;  %v1151_v21 = vadd.f32 %v1095_v45, %v787_v14  ;;  %v2533_v8 = vrot.slane %v622_v26, %v1653_v5  ;;  %v846_v1 = vrot.slane %v2473_v23, %v1655_v6 }
  0x57   :  { %3433 = vst [vmem:[#allocation94_spill] sm:$0xff] %v2527_v19  ;;  %v986_v0 = vrot.slane %v2492_v29, %v1655_v6  ;;  %v1459_v9 = vsub.f32 %v1305_v33, %v1445_v59  ;;  %v382_v41 = vmul.f32 %v2527_v19, %v1879_v3  ;;  %v1210_v24 = vrot.slane %v2473_v23, %v1657_v7 }
  0x58   :  { %3434 = vst [vmem:[#allocation95_spill] sm:$0xff] %v2530_v30  ;;  %3435 = vst [vmem:[#allocation96_spill] sm:$0xff] %v2533_v8  ;;  %v578_v28 = vmul.f32 %v2530_v30, %v1891_v57  ;;  %v718_v14 = vmul.f32 %v2533_v8, %v1896_v58  ;;  %v2548_v45 = vrot.slane %v846_v1, %v1655_v6 }
  0x59   :  { %v2551_v26 = vrot.slane %v986_v0, %v1655_v6  ;;  %v1350_v33 = vrot.slane %v2492_v29, %v1657_v7  ;;  %v1515_v59 = vadd.f32 %v1459_v9, %v1151_v21  ;;  %v396_v19 = vsub.f32 %v234_v52, %v382_v41 }
  0x5a   :  { %3436 = vst [vmem:[#allocation97_spill] sm:$0xff] %v2548_v45  ;;  %v2556_v35 = vrot.slane %v1210_v24, %v1657_v7  ;;  %v142_v30 = vrot.slane %v2473_v23, %v1755_v42  ;;  %v732_v40 = vsub.f32 %v578_v28, %v718_v14  ;;  %v942_v8 = vmul.f32 %v2548_v45, %v1909_v32 }
  0x5b   :  { %3437 = vst [vmem:[#allocation98_spill] sm:$0xff] %v2551_v26  ;;  %v1082_v1 = vmul.f32 %v2551_v26, %v1924_v38  ;;  %v2565_v0 = vrot.slane %v1350_v33, %v1657_v7  ;;  %1543 = vst [vmem:[%s3184_s4 + $0x40] sm:$0x3f] %v1515_v59  ;;  %v290_v52 = vrot.slane %v2492_v29, %v1755_v42 }
  0x5c   :  { %3438 = vst [vmem:[#allocation99_spill] sm:$0xff] %v2556_v35  ;;  %v1306_v9 = vmul.f32 %v2556_v35, %v1947_v48  ;;  %v2573_v41 = vrot.slane %v142_v30, %v1651_v4  ;;  %v486_v21 = vrot.slane %v2473_v23, %v1757_v43  ;;  %v788_v28 = vadd.f32 %v732_v40, %v396_v19 }
  0x5d   :  { %3439 = vst [vmem:[#allocation100_spill] sm:$0xff] %v2565_v0  ;;  %v1096_v24 = vsub.f32 %v942_v8, %v1082_v1  ;;  %v1446_v14 = vmul.f32 %v2565_v0, %v1958_v39  ;;  %v626_v33 = vrot.slane %v2492_v29, %v1757_v43  ;;  %v2586_v30 = vrot.slane %v290_v52, %v1651_v4 }
  0x5e   :  { %3440 = vst [vmem:[#allocation101_spill] sm:$0xff] %v2573_v41  ;;  %v235_v59 = vmul.f32 %v2573_v41, %v1966_v51  ;;  %v2589_v35 = vrot.slane %v486_v21, %v1653_v5  ;;  %v850_v26 = vrot.slane %v2473_v23, %v1759_v46  ;;  %v990_v1 = vrot.slane %v2492_v29, %v1759_v46  ;;  %v2601_v41 = vld [vmem:[%s3180_s0 + $0x2c] sm:$0xff] }
  0x5f   :  { %3441 = vst [vmem:[#allocation102_spill] sm:$0xff] %v2586_v30  ;;  %v1152_v40 = vadd.f32 %v1096_v24, %v788_v28  ;;  %v1460_v19 = vsub.f32 %v1306_v9, %v1446_v14  ;;  %v2594_v8 = vrot.slane %v626_v33, %v1653_v5  ;;  %v383_v52 = vmul.f32 %v2586_v30, %v1983_v34  ;;  %v2615_v24 = vld [vmem:[%s3181_s1 + $0x2c] sm:$0xff] }
  0x60   :  { %3442 = vst [vmem:[#allocation103_spill] sm:$0xff] %v2589_v35  ;;  %v579_v21 = vmul.f32 %v2589_v35, %v1978_v60  ;;  %v2608_v28 = vrot.slane %v850_v26, %v1655_v6  ;;  %v1214_v9 = vrot.slane %v2473_v23, %v1761_v47  ;;  %v2620_v30 = vrot.slane %v990_v1, %v1655_v6 }
  0x61   :  { %3443 = vst [vmem:[#allocation104_spill] sm:$0xff] %v2594_v8  ;;  %v1516_v14 = vadd.f32 %v1460_v19, %v1152_v40  ;;  %v719_v33 = vmul.f32 %v2594_v8, %v2006_v36  ;;  %v1354_v35 = vrot.slane %v2492_v29, %v1761_v47  ;;  %v397_v26 = vsub.f32 %v235_v59, %v383_v52 }
  0x62   :  { %3444 = vst [vmem:[#allocation105_spill] sm:$0xff] %v2608_v28  ;;  %3445 = vst [vmem:[#allocation106_spill] sm:$0xff] %v2620_v30  ;;  %v943_v0 = vmul.f32 %v2608_v28, %v2020_v13  ;;  %v2627_v23 = vrot.slane %v1214_v9, %v1657_v7  ;;  %v146_v45 = vrot.slane %v2601_v41, %v1651_v4  ;;  %v3450_v28 = vld [vmem:[#allocation34_spill] sm:$0xff] }
  0x63   :  { %1544 = vst [vmem:[%s3184_s4 + $0x48] sm:$0x3f] %v1516_v14  ;;  %v733_v40 = vsub.f32 %v579_v21, %v719_v33  ;;  %v1083_v19 = vmul.f32 %v2620_v30, %v2034_v2  ;;  %v2637_v29 = vrot.slane %v1354_v35, %v1657_v7  ;;  %v294_v59 = vrot.slane %v2615_v24, %v1651_v4 }
  0x64   :  { %3446 = vst [vmem:[#allocation107_spill] sm:$0xff] %v2627_v23  ;;  %v1307_v1 = vmul.f32 %v2627_v23, %v2051_v12  ;;  %v2644_v52 = vrot.slane %v146_v45, %v1651_v4  ;;  %v490_v9 = vrot.slane %v2601_v41, %v1653_v5  ;;  %v630_v21 = vrot.slane %v2615_v24, %v1653_v5 }
  0x65   :  { %3447 = vst [vmem:[#allocation108_spill] sm:$0xff] %v2637_v29  ;;  %v789_v14 = vadd.f32 %v733_v40, %v397_v26  ;;  %v1097_v33 = vsub.f32 %v943_v0, %v1083_v19  ;;  %v1447_v35 = vmul.f32 %v2637_v29, %v2056_v37  ;;  %v2653_v30 = vrot.slane %v294_v59, %v1651_v4  ;;  %v3453_v40 = vld [vmem:[#allocation36_spill] sm:$0xff]  ;;  %v3454_v29 = vld [vmem:[#allocation37_spill] sm:$0xff] }
  0x66   :  { %3448 = vst [vmem:[#allocation109_spill] sm:$0xff] %v2644_v52  ;;  %v236_v23 = vmul.f32 %v2644_v52, %v3450_v28  ;;  %v2658_v45 = vrot.slane %v490_v9, %v1653_v5  ;;  %v2661_v8 = vrot.slane %v630_v21, %v1653_v5  ;;  %v854_v56 = vrot.slane %v2601_v41, %v1655_v6 }
  0x67   :  { %3449 = vst [vmem:[#allocation110_spill] sm:$0xff] %v2653_v30  ;;  %v1153_v26 = vadd.f32 %v1097_v33, %v789_v14  ;;  %v1461_v0 = vsub.f32 %v1307_v1, %v1447_v35  ;;  %v384_v19 = vmul.f32 %v2653_v30, %v3453_v40  ;;  %v994_v59 = vrot.slane %v2615_v24, %v1655_v6 }
  0x68   :  { %3451 = vst [vmem:[#allocation34_spill] sm:$0xff] %v2658_v45  ;;  %3452 = vst [vmem:[#allocation111_spill] sm:$0xff] %v2661_v8  ;;  %v580_v52 = vmul.f32 %v2658_v45, %v2104_v31  ;;  %v720_v9 = vmul.f32 %v2661_v8, %v3454_v29  ;;  %v2674_v21 = vrot.slane %v854_v56, %v1655_v6 }
  0x69   :  { %v1218_v27 = vrot.slane %v2601_v41, %v1657_v7  ;;  %v1517_v14 = vadd.f32 %v1461_v0, %v1153_v26  ;;  %v398_v1 = vsub.f32 %v236_v23, %v384_v19  ;;  %v2679_v33 = vrot.slane %v994_v59, %v1655_v6  ;;  %v3459_v23 = vld [vmem:[#allocation43_spill] sm:$0xff]  ;;  %v3461_v59 = vld [vmem:[#allocation42_spill] sm:$0xff] }
  0x6a   :  { %3455 = vst [vmem:[#allocation36_spill] sm:$0xff] %v2674_v21  ;;  %v1358_v35 = vrot.slane %v2615_v24, %v1657_v7  ;;  %v734_v30 = vsub.f32 %v580_v52, %v720_v9  ;;  %v944_v45 = vmul.f32 %v2674_v21, %v3457_v10  ;;  %v150_v56 = vrot.slane %v2601_v41, %v1755_v42 }
  0x6b   :  { %3456 = vst [vmem:[#allocation37_spill] sm:$0xff] %v2679_v33  ;;  %v2686_v8 = vrot.slane %v1218_v27, %v1657_v7  ;;  %1545 = vst [vmem:[%s3184_s4 + $0x50] sm:$0x3f] %v1517_v14  ;;  %v1084_v26 = vmul.f32 %v2679_v33, %v3459_v23  ;;  %v298_v52 = vrot.slane %v2615_v24, %v1755_v42 }
  0x6c   :  { %v2696_v0 = vrot.slane %v1358_v35, %v1657_v7  ;;  %v494_v27 = vrot.slane %v2601_v41, %v1757_v43  ;;  %v790_v19 = vadd.f32 %v734_v30, %v398_v1  ;;  %v2705_v21 = vrot.slane %v150_v56, %v1651_v4  ;;  %v3466_v30 = vld [vmem:[#allocation49_spill] sm:$0xff] }
  0x6d   :  { %3458 = vst [vmem:[#allocation112_spill] sm:$0xff] %v2686_v8  ;;  %v1308_v9 = vmul.f32 %v2686_v8, %v3461_v59  ;;  %v634_v14 = vrot.slane %v2615_v24, %v1757_v43  ;;  %v1098_v33 = vsub.f32 %v944_v45, %v1084_v26  ;;  %v2712_v10 = vrot.slane %v298_v52, %v1651_v4  ;;  %v26_v45 = vld [vmem:[%s3180_s0 + $0x34] sm:$0xf]  ;;  %v3469_v59 = vld [vmem:[#allocation50_spill] sm:$0xff] }
  0x6e   :  { %3460 = vst [vmem:[#allocation113_spill] sm:$0xff] %v2696_v0  ;;  %3462 = vst [vmem:[#allocation114_spill] sm:$0xff] %v2705_v21  ;;  %v1448_v35 = vmul.f32 %v2696_v0, %v3463_v18  ;;  %v2715_v42 = vrot.slane %v494_v27, %v1653_v5  ;;  %v237_v1 = vmul.f32 %v2705_v21, %v3466_v30  ;;  %v3468_v27 = vld [vmem:[#allocation51_spill] sm:$0xff] }
  0x6f   :  { %3464 = vst [vmem:[#allocation115_spill] sm:$0xff] %v2712_v10  ;;  %v2720_v8 = vrot.slane %v634_v14, %v1653_v5  ;;  %v858_v56 = vrot.slane %v2601_v41, %v1759_v46  ;;  %v998_v43 = vrot.slane %v2615_v24, %v1759_v46  ;;  %v1154_v26 = vadd.f32 %v1098_v33, %v790_v19  ;;  %v3470_v14 = vld [vmem:[#allocation53_spill] sm:$0xff]  ;;  %v34_v33 = vld [vmem:[%s3181_s1 + $0x34] sm:$0xf] }
  0x70   :  { %3465 = vst [vmem:[#allocation116_spill] sm:$0xff] %v2715_v42  ;;  %v1462_v52 = vsub.f32 %v1308_v9, %v1448_v35  ;;  %v385_v0 = vmul.f32 %v2712_v10, %v3468_v27  ;;  %v581_v21 = vmul.f32 %v2715_v42, %v3469_v59  ;;  %v1222_v23 = vrot.slane %v2601_v41, %v1761_v47 }
  0x71   :  { %3467 = vst [vmem:[#allocation117_spill] sm:$0xff] %v2720_v8  ;;  %v721_v30 = vmul.f32 %v2720_v8, %v3470_v14  ;;  %v2736_v18 = vrot.slane %v858_v56, %v1655_v6  ;;  %v2739_v46 = vrot.slane %v998_v43, %v1655_v6  ;;  %v1362_v35 = vrot.slane %v2615_v24, %v1761_v47  ;;  %v3473_v56 = vld [vmem:[#allocation56_spill] sm:$0xff]  ;;  %v3474_v43 = vld [vmem:[#allocation58_spill] sm:$0xff] }
  0x72   :  { %v1518_v19 = vadd.f32 %v1462_v52, %v1154_v26  ;;  %v399_v9 = vsub.f32 %v237_v1, %v385_v0  ;;  %v154_v8 = vrot.slane %v26_v45, %v1651_v4  ;;  %v2754_v41 = vrot.slane %v1222_v23, %v1657_v7  ;;  %v3478_v26 = vld [vmem:[#allocation61_spill] sm:$0xff] }
  0x73   :  { %3471 = vst [vmem:[#allocation51_spill] sm:$0xff] %v2736_v18  ;;  %3472 = vst [vmem:[#allocation53_spill] sm:$0xff] %v2739_v46  ;;  %v735_v42 = vsub.f32 %v581_v21, %v721_v30  ;;  %v945_v10 = vmul.f32 %v2736_v18, %v3473_v56  ;;  %v1085_v59 = vmul.f32 %v2739_v46, %v3474_v43  ;;  %v3479_v46 = vld [vmem:[#allocation62_spill] sm:$0xff]  ;;  %v3480_v18 = vld [vmem:[#allocation65_spill] sm:$0xff] }
  0x74   :  { %3475 = vst [vmem:[#allocation118_spill] sm:$0xff] %v2754_v41  ;;  %1546 = vst [vmem:[%s3184_s4 + $0x58] sm:$0x3f] %v1518_v19  ;;  %v2760_v0 = vrot.slane %v1362_v35, %v1657_v7  ;;  %v2763_v47 = vrot.slane %v154_v8, %v1651_v4  ;;  %v302_v24 = vrot.slane %v34_v33, %v1651_v4 }
  0x75   :  { %v498_v21 = vrot.slane %v26_v45, %v1653_v5  ;;  %v791_v30 = vadd.f32 %v735_v42, %v399_v9  ;;  %v1099_v1 = vsub.f32 %v945_v10, %v1085_v59  ;;  %v1309_v23 = vmul.f32 %v2754_v41, %v3478_v26  ;;  %v3484_v41 = vld [vmem:[#allocation67_spill] sm:$0xff] }
  0x76   :  { %3476 = vst [vmem:[#allocation119_spill] sm:$0xff] %v2760_v0  ;;  %3477 = vst [vmem:[#allocation120_spill] sm:$0xff] %v2763_v47  ;;  %v638_v52 = vrot.slane %v34_v33, %v1653_v5  ;;  %v1449_v19 = vmul.f32 %v2760_v0, %v3479_v46  ;;  %v238_v35 = vmul.f32 %v2763_v47, %v3480_v18 }
  0x77   :  { %v2775_v8 = vrot.slane %v302_v24, %v1651_v4  ;;  %v2778_v56 = vrot.slane %v498_v21, %v1653_v5  ;;  %v1155_v43 = vadd.f32 %v1099_v1, %v791_v30  ;;  %v862_v59 = vrot.slane %v26_v45, %v1655_v6  ;;  %v3485_v24 = vld [vmem:[#allocation68_spill] sm:$0xff] }
  0x78   :  { %v2781_v10 = vrot.slane %v638_v52, %v1653_v5  ;;  %v1002_v42 = vrot.slane %v34_v33, %v1655_v6  ;;  %v1463_v9 = vsub.f32 %v1309_v23, %v1449_v19  ;;  %v1226_v4 = vrot.slane %v26_v45, %v1657_v7 }
  0x79   :  { %3481 = vst [vmem:[#allocation61_spill] sm:$0xff] %v2775_v8  ;;  %3482 = vst [vmem:[#allocation62_spill] sm:$0xff] %v2778_v56  ;;  %v386_v0 = vmul.f32 %v2775_v8, %v2304_v20  ;;  %v582_v47 = vmul.f32 %v2778_v56, %v3484_v41  ;;  %v2793_v30 = vrot.slane %v862_v59, %v1655_v6  ;;  %v3489_v56 = vld [vmem:[#allocation2_spill] sm:$0xff] }
  0x7a   :  { %3483 = vst [vmem:[#allocation65_spill] sm:$0xff] %v2781_v10  ;;  %v722_v21 = vmul.f32 %v2781_v10, %v3485_v24  ;;  %v2796_v5 = vrot.slane %v1002_v42, %v1655_v6  ;;  %v1366_v1 = vrot.slane %v34_v33, %v1657_v7  ;;  %v1519_v23 = vadd.f32 %v1463_v9, %v1155_v43 }
  0x7b   :  { %3486 = vst [vmem:[#allocation67_spill] sm:$0xff] %v2793_v30  ;;  %v400_v52 = vsub.f32 %v238_v35, %v386_v0  ;;  %v2800_v19 = vrot.slane %v1226_v4, %v1657_v7  ;;  %v401_v8 = vmul.f32 %v3489_v56, %v1685_v15  ;;  %v946_v10 = vmul.f32 %v2793_v30, %v2332_v11  ;;  %v2819_v15 = vld [vmem:[%s3182_s2] sm:$0x3f]  ;;  %v3492_v56 = vld [vmem:[#allocation3_spill] sm:$0xff]  ;;  %v3493_v0 = vld [vmem:[#allocation4_spill] sm:$0xff] }
  0x7c   :  { %3487 = vst [vmem:[#allocation68_spill] sm:$0xff] %v2796_v5  ;;  %v736_v45 = vsub.f32 %v582_v47, %v722_v21  ;;  %v1086_v59 = vmul.f32 %v2796_v5, %v2337_v25  ;;  %v2809_v6 = vrot.slane %v1366_v1, %v1657_v7  ;;  %1547 = vst [vmem:[%s3184_s4 + $0x60] sm:$0x3f] %v1519_v23  ;;  %v2828_v7 = vld [vmem:[%s3182_s2 + $0x38] sm:$0x3f]  ;;  %v3496_v21 = vld [vmem:[#allocation74_spill] sm:$0xff] }
  0x7d   :  { %3488 = vst [vmem:[#allocation121_spill] sm:$0xff] %v2800_v19  ;;  %v1310_v33 = vmul.f32 %v2800_v19, %v2354_v17  ;;  %3491 = vst [vmem:[#allocation122_spill] sm:$0xff] %v2819_v15  ;;  %v415_v43 = vmul.f32 %v2819_v15, %v3492_v56  ;;  %v737_v47 = vmul.f32 %v3493_v0, %v1690_v16  ;;  %v3495_v35 = vld [vmem:[#allocation5_spill] sm:$0xff]  ;;  %v3497_v23 = vld [vmem:[#allocation6_spill] sm:$0xff] }
  0x7e   :  { %3490 = vst [vmem:[#allocation2_spill] sm:$0xff] %v2809_v6  ;;  %3494 = vst [vmem:[#allocation3_spill] sm:$0xff] %v2828_v7  ;;  %v751_v42 = vmul.f32 %v2828_v7, %v3495_v35  ;;  %v792_v9 = vadd.f32 %v736_v45, %v400_v52  ;;  %v1100_v4 = vsub.f32 %v946_v10, %v1086_v59  ;;  %v2839_v16 = vld [vmem:[%s3182_s2 + $0x70] sm:$0x3f]  ;;  %v3499_v0 = vld [vmem:[#allocation7_spill] sm:$0xff] }
  0x7f   :  { %v1450_v1 = vmul.f32 %v2809_v6, %v3496_v21  ;;  %v1101_v19 = vmul.f32 %v3497_v23, %v1708_v22  ;;  %v429_v56 = vadd.f32 %v415_v43, %v401_v8  ;;  %3498 = vst [vmem:[#allocation4_spill] sm:$0xff] %v2839_v16  ;;  %v1115_v30 = vmul.f32 %v2839_v16, %v3499_v0  ;;  %v2846_v10 = vld [vmem:[%s3183_s3 + $0xa8] sm:$0x3f]  ;;  %v3501_v52 = vld [vmem:[#allocation8_spill] sm:$0xff]  ;;  %v3503_v43 = vld [vmem:[#allocation9_spill] sm:$0xff] }
  0x80   :  { %v765_v5 = vadd.f32 %v751_v42, %v737_v47  ;;  %3500 = vst [vmem:[#allocation5_spill] sm:$0xff] %v2846_v10  ;;  %v1465_v45 = vmul.f32 %v2846_v10, %v3501_v52  ;;  %v1156_v59 = vadd.f32 %v1100_v4, %v792_v9  ;;  %v2853_v8 = vld [vmem:[%s3182_s2 + $0xa8] sm:$0x3f]  ;;  %v3504_v35 = vld [vmem:[#allocation10_spill] sm:$0xff]  ;;  %v3506_v52 = vld [vmem:[#allocation12_spill] sm:$0xff] }
  0x81   :  { %v1464_v22 = vsub.f32 %v1310_v33, %v1450_v1  ;;  %3502 = vst [vmem:[#allocation74_spill] sm:$0xff] %v2853_v8  ;;  %v1479_v47 = vmul.f32 %v2853_v8, %v3503_v43  ;;  %v402_v42 = vmul.f32 %v3504_v35, %v1787_v55  ;;  %v1129_v0 = vadd.f32 %v1115_v30, %v1101_v19  ;;  %v3505_v6 = vld [vmem:[#allocation11_spill] sm:$0xff]  ;;  %v3507_v1 = vld [vmem:[#allocation13_spill] sm:$0xff]  ;;  %v3508_v7 = vld [vmem:[#allocation14_spill] sm:$0xff] }
  0x82   :  { %v793_v23 = vadd.f32 %v765_v5, %v429_v56  ;;  %v416_v16 = vmul.f32 %v3505_v6, %v1766_v49  ;;  %v738_v9 = vmul.f32 %v3506_v52, %v1805_v62  ;;  %v752_v10 = vmul.f32 %v3507_v1, %v1777_v53  ;;  %v3509_v55 = vld [vmem:[#allocation15_spill] sm:$0xff]  ;;  %v3510_v30 = vld [vmem:[#allocation16_spill] sm:$0xff]  ;;  %v3511_v62 = vld [vmem:[#allocation17_spill] sm:$0xff] }
  0x83   :  { %v1520_v33 = vadd.f32 %v1464_v22, %v1156_v59  ;;  %v1493_v4 = vadd.f32 %v1479_v47, %v1465_v45  ;;  %v1102_v15 = vmul.f32 %v3508_v7, %v1810_v63  ;;  %v1116_v5 = vmul.f32 %v3509_v55, %v1782_v54  ;;  %v3512_v53 = vld [vmem:[#allocation18_spill] sm:$0xff]  ;;  %v3513_v63 = vld [vmem:[#allocation19_spill] sm:$0xff]  ;;  %v3514_v54 = vld [vmem:[#allocation20_spill] sm:$0xff] }
  0x84   :  { %v1157_v43 = vadd.f32 %v1129_v0, %v793_v23  ;;  %v430_v8 = vadd.f32 %v416_v16, %v402_v42  ;;  %v1466_v19 = vmul.f32 %v3510_v30, %v1869_v44  ;;  %v766_v49 = vadd.f32 %v752_v10, %v738_v9  ;;  %v3515_v44 = vld [vmem:[#allocation21_spill] sm:$0xff]  ;;  %v3516_v42 = vld [vmem:[#allocation22_spill] sm:$0xff]  ;;  %v3518_v23 = vld [vmem:[#allocation24_spill] sm:$0xff] }
  0x85   :  { %1548 = vst [vmem:[%s3184_s4 + $0x68] sm:$0x3f] %v1520_v33  ;;  %v1480_v6 = vmul.f32 %v3511_v62, %v1800_v61  ;;  %v403_v56 = vmul.f32 %v3512_v53, %v1879_v3  ;;  %v417_v7 = vmul.f32 %v3513_v63, %v1874_v50  ;;  %v1130_v45 = vadd.f32 %v1116_v5, %v1102_v15  ;;  %v3517_v50 = vld [vmem:[#allocation23_spill] sm:$0xff]  ;;  %v3519_v0 = vld [vmem:[#allocation25_spill] sm:$0xff]  ;;  %v3520_v52 = vld [vmem:[#allocation26_spill] sm:$0xff] }
  0x86   :  { %v1521_v16 = vadd.f32 %v1493_v4, %v1157_v43  ;;  %v739_v59 = vmul.f32 %v3514_v54, %v1896_v58  ;;  %v753_v22 = vmul.f32 %v3515_v44, %v1891_v57  ;;  %v794_v47 = vadd.f32 %v766_v49, %v430_v8  ;;  %v3522_v4 = vld [vmem:[#allocation28_spill] sm:$0xff]  ;;  %v3525_v62 = vld [vmem:[#allocation31_spill] sm:$0xff] }
  0x87   :  { %v1494_v35 = vadd.f32 %v1480_v6, %v1466_v19  ;;  %v431_v10 = vadd.f32 %v417_v7, %v403_v56  ;;  %v1103_v61 = vmul.f32 %v3516_v42, %v1924_v38  ;;  %v1117_v15 = vmul.f32 %v3517_v50, %v1909_v32  ;;  %v3521_v38 = vld [vmem:[#allocation27_spill] sm:$0xff]  ;;  %v3523_v32 = vld [vmem:[#allocation29_spill] sm:$0xff] }
  0x88   :  { %1549 = vst [vmem:[%s3185_s5] sm:$0x3f] %v1521_v16  ;;  %v767_v3 = vadd.f32 %v753_v22, %v739_v59  ;;  %v1467_v58 = vmul.f32 %v3518_v23, %v1958_v39  ;;  %v1481_v57 = vmul.f32 %v3519_v0, %v1947_v48  ;;  %v1158_v8 = vadd.f32 %v1130_v45, %v794_v47  ;;  %v3524_v48 = vld [vmem:[#allocation30_spill] sm:$0xff]  ;;  %v3528_v7 = vld [vmem:[#allocation35_spill] sm:$0xff]  ;;  %v3531_v22 = vld [vmem:[#allocation40_spill] sm:$0xff] }
  0x89   :  { %v404_v9 = vmul.f32 %v3520_v52, %v1983_v34  ;;  %v418_v33 = vmul.f32 %v3521_v38, %v1966_v51  ;;  %v740_v1 = vmul.f32 %v3522_v4, %v2006_v36  ;;  %v1131_v55 = vadd.f32 %v1117_v15, %v1103_v61  ;;  %v3526_v51 = vld [vmem:[#allocation32_spill] sm:$0xff]  ;;  %v3527_v36 = vld [vmem:[#allocation33_spill] sm:$0xff]  ;;  %v3537_v15 = vld [vmem:[#allocation47_spill] sm:$0xff] }
  0x8a   :  { %v795_v43 = vadd.f32 %v767_v3, %v431_v10  ;;  %v1495_v5 = vadd.f32 %v1481_v57, %v1467_v58  ;;  %v754_v30 = vmul.f32 %v3523_v32, %v1978_v60  ;;  %v1522_v39 = vadd.f32 %v1494_v35, %v1158_v8  ;;  %v3532_v35 = vld [vmem:[#allocation43_spill] sm:$0xff]  ;;  %v3533_v10 = vld [vmem:[#allocation44_spill] sm:$0xff]  ;;  %v3534_v61 = vld [vmem:[#allocation41_spill] sm:$0xff] }
  0x8b   :  { %v432_v19 = vadd.f32 %v418_v33, %v404_v9  ;;  %v1104_v49 = vmul.f32 %v3524_v48, %v2034_v2  ;;  %v1118_v34 = vmul.f32 %v3525_v62, %v2020_v13  ;;  %v1468_v56 = vmul.f32 %v3526_v51, %v2056_v37  ;;  %v3529_v2 = vld [vmem:[#allocation38_spill] sm:$0xff]  ;;  %v3530_v13 = vld [vmem:[#allocation39_spill] sm:$0xff]  ;;  %v3539_v0 = vld [vmem:[#allocation48_spill] sm:$0xff] }
  0x8c   :  { %v1159_v6 = vadd.f32 %v1131_v55, %v795_v43  ;;  %v768_v53 = vadd.f32 %v754_v30, %v740_v1  ;;  %v1482_v63 = vmul.f32 %v3527_v36, %v2051_v12  ;;  %1550 = vst [vmem:[%s3185_s5 + $0x8] sm:$0x3f] %v1522_v39  ;;  %v405_v16 = vmul.f32 %v3528_v7, %v3453_v40  ;;  %v3535_v3 = vld [vmem:[#allocation46_spill] sm:$0xff]  ;;  %v3536_v40 = vld [vmem:[#allocation45_spill] sm:$0xff]  ;;  %v3543_v4 = vld [vmem:[#allocation55_spill] sm:$0xff] }
  0x8d   :  { %v1132_v60 = vadd.f32 %v1118_v34, %v1104_v49  ;;  %v419_v45 = vmul.f32 %v3529_v2, %v3450_v28  ;;  %v741_v54 = vmul.f32 %v3530_v13, %v3454_v29  ;;  %v755_v12 = vmul.f32 %v3531_v22, %v2104_v31  ;;  %v3538_v58 = vld [vmem:[#allocation42_spill] sm:$0xff]  ;;  %v3540_v31 = vld [vmem:[#allocation52_spill] sm:$0xff]  ;;  %v3541_v9 = vld [vmem:[#allocation49_spill] sm:$0xff] }
  0x8e   :  { %v1523_v59 = vadd.f32 %v1495_v5, %v1159_v6  ;;  %v796_v44 = vadd.f32 %v768_v53, %v432_v19  ;;  %v1496_v37 = vadd.f32 %v1482_v63, %v1468_v56  ;;  %v1105_v42 = vmul.f32 %v3533_v10, %v3532_v35  ;;  %v3542_v38 = vld [vmem:[#allocation54_spill] sm:$0xff]  ;;  %v3545_v55 = vld [vmem:[#allocation57_spill] sm:$0xff]  ;;  %v3547_v48 = vld [vmem:[#allocation59_spill] sm:$0xff] }
  0x8f   :  { %v433_v47 = vadd.f32 %v419_v45, %v405_v16  ;;  %v1119_v50 = vmul.f32 %v3535_v3, %v3534_v61  ;;  %v1469_v23 = vmul.f32 %v3537_v15, %v3536_v40  ;;  %v769_v29 = vadd.f32 %v755_v12, %v741_v54  ;;  %v3544_v43 = vld [vmem:[#allocation50_spill] sm:$0xff]  ;;  %v3548_v6 = vld [vmem:[#allocation56_spill] sm:$0xff]  ;;  %v3550_v56 = vld [vmem:[#allocation63_spill] sm:$0xff] }
  0x90   :  { %1551 = vst [vmem:[%s3185_s5 + $0x10] sm:$0x3f] %v1523_v59  ;;  %v1160_v28 = vadd.f32 %v1132_v60, %v796_v44  ;;  %v1483_v57 = vmul.f32 %v3539_v0, %v3538_v58  ;;  %v406_v8 = vmul.f32 %v3540_v31, %v3468_v27  ;;  %v420_v33 = vmul.f32 %v3542_v38, %v3541_v9  ;;  %v3546_v19 = vld [vmem:[#allocation58_spill] sm:$0xff]  ;;  %v3549_v53 = vld [vmem:[#allocation60_spill] sm:$0xff]  ;;  %v3553_v45 = vld [vmem:[#allocation69_spill] sm:$0xff] }
  0x91   :  { %v1133_v52 = vadd.f32 %v1119_v50, %v1105_v42  ;;  %v742_v1 = vmul.f32 %v3543_v4, %v3470_v14  ;;  %v756_v5 = vmul.f32 %v3545_v55, %v3544_v43  ;;  %v797_v30 = vadd.f32 %v769_v29, %v433_v47  ;;  %v3551_v60 = vld [vmem:[#allocation64_spill] sm:$0xff]  ;;  %v3552_v16 = vld [vmem:[#allocation66_spill] sm:$0xff]  ;;  %v3555_v22 = vld [vmem:[#allocation71_spill] sm:$0xff] }
  0x92   :  { %v1524_v32 = vadd.f32 %v1496_v37, %v1160_v28  ;;  %v1497_v39 = vadd.f32 %v1483_v57, %v1469_v23  ;;  %v1106_v49 = vmul.f32 %v3547_v48, %v3546_v19  ;;  %v434_v62 = vadd.f32 %v420_v33, %v406_v8  ;;  %v3554_v44 = vld [vmem:[#allocation70_spill] sm:$0xff]  ;;  %v3556_v42 = vld [vmem:[#allocation72_spill] sm:$0xff]  ;;  %v3557_v40 = vld [vmem:[#allocation73_spill] sm:$0xff] }
  0x93   :  { %v770_v34 = vadd.f32 %v756_v5, %v742_v1  ;;  %v1120_v51 = vmul.f32 %v3549_v53, %v3548_v6  ;;  %v1470_v36 = vmul.f32 %v3550_v56, %v3479_v46  ;;  %v1161_v63 = vadd.f32 %v1133_v52, %v797_v30  ;;  %v3558_v23 = vld [vmem:[#allocation75_spill] sm:$0xff]  ;;  %v3559_v29 = vld [vmem:[#allocation76_spill] sm:$0xff]  ;;  %v1576_v0 = vld [vmem:[%s3183_s3] sm:$0x3f] }
  0x94   :  { %1552 = vst [vmem:[%s3185_s5 + $0x18] sm:$0x3f] %v1524_v32  ;;  %v1484_v7 = vmul.f32 %v3551_v60, %v3478_v26  ;;  %v407_v2 = vmul.f32 %v3552_v16, %v2304_v20  ;;  %v421_v13 = vmul.f32 %v3553_v45, %v3480_v18  ;;  %v743_v37 = vmul.f32 %v3554_v44, %v3485_v24  ;;  %v3560_v57 = vld [vmem:[#allocation77_spill] sm:$0xff]  ;;  %v3561_v8 = vld [vmem:[#allocation78_spill] sm:$0xff]  ;;  %v3563_v4 = vld [vmem:[#allocation79_spill] sm:$0xff] }
  0x95   :  { %v798_v54 = vadd.f32 %v770_v34, %v434_v62  ;;  %v1134_v59 = vadd.f32 %v1120_v51, %v1106_v49  ;;  %v757_v12 = vmul.f32 %v3555_v22, %v3484_v41  ;;  %v1525_v47 = vadd.f32 %v1497_v39, %v1161_v63  ;;  %v3562_v52 = vld [vmem:[#allocation122_spill] sm:$0xff]  ;;  %v1577_v33 = vld [vmem:[%s3183_s3 + $0x38] sm:$0x3f]  ;;  %v3564_v30 = vld [vmem:[#allocation80_spill] sm:$0xff] }
  0x96   :  { %v1498_v35 = vadd.f32 %v1484_v7, %v1470_v36  ;;  %v435_v10 = vadd.f32 %v421_v13, %v407_v2  ;;  %v1107_v61 = vmul.f32 %v3556_v42, %v2337_v25  ;;  %v1121_v15 = vmul.f32 %v3557_v40, %v2332_v11  ;;  %v3565_v39 = vld [vmem:[#allocation3_spill] sm:$0xff]  ;;  %v1578_v34 = vld [vmem:[%s3183_s3 + $0x70] sm:$0x3f]  ;;  %v3566_v53 = vld [vmem:[#allocation81_spill] sm:$0xff] }
  0x97   :  { %v1162_v3 = vadd.f32 %v1134_v59, %v798_v54  ;;  %v771_v50 = vadd.f32 %v757_v12, %v743_v37  ;;  %v1471_v28 = vmul.f32 %v3558_v23, %v3496_v21  ;;  %1553 = vst [vmem:[%s3185_s5 + $0x20] sm:$0x3f] %v1525_v47  ;;  %v1485_v58 = vmul.f32 %v3559_v29, %v2354_v17  ;;  %v3567_v56 = vld [vmem:[#allocation82_spill] sm:$0xff]  ;;  %v3568_v36 = vld [vmem:[#allocation4_spill] sm:$0xff]  ;;  %v3569_v16 = vld [vmem:[#allocation83_spill] sm:$0xff] }
  0x98   :  { %v408_v31 = vmul.f32 %v1576_v0, %v3560_v57  ;;  %v422_v38 = vmul.f32 %v3562_v52, %v3561_v8  ;;  %v744_v1 = vmul.f32 %v1577_v33, %v3563_v4  ;;  %v1135_v32 = vadd.f32 %v1121_v15, %v1107_v61  ;;  %v3570_v2 = vld [vmem:[#allocation5_spill] sm:$0xff]  ;;  %v3571_v13 = vld [vmem:[#allocation84_spill] sm:$0xff]  ;;  %v3572_v54 = vld [vmem:[#allocation74_spill] sm:$0xff] }
  0x99   :  { %v1526_v55 = vadd.f32 %v1498_v35, %v1162_v3  ;;  %v799_v5 = vadd.f32 %v771_v50, %v435_v10  ;;  %v758_v48 = vmul.f32 %v3565_v39, %v3564_v30  ;;  %v1499_v49 = vadd.f32 %v1485_v58, %v1471_v28  ;;  %v1579_v37 = vld [vmem:[%s3183_s3 + $0x8] sm:$0x3f]  ;;  %v3573_v22 = vld [vmem:[#allocation85_spill] sm:$0xff]  ;;  %v3574_v35 = vld [vmem:[#allocation86_spill] sm:$0xff] }
  0x9a   :  { %v436_v62 = vadd.f32 %v422_v38, %v408_v31  ;;  %v1108_v51 = vmul.f32 %v1578_v34, %v3566_v53  ;;  %v1122_v63 = vmul.f32 %v3568_v36, %v3567_v56  ;;  %v1472_v45 = vmul.f32 %v3570_v2, %v3569_v16  ;;  %v1580_v47 = vld [vmem:[%s3182_s2 + $0x8] sm:$0x3f]  ;;  %v1581_v42 = vld [vmem:[%s3183_s3 + $0x40] sm:$0x3f]  ;;  %v3576_v28 = vld [vmem:[#allocation88_spill] sm:$0xff] }
  0x9b   :  { %1554 = vst [vmem:[%s3185_s5 + $0x28] sm:$0x3f] %v1526_v55  ;;  %v1163_v60 = vadd.f32 %v1135_v32, %v799_v5  ;;  %v772_v7 = vadd.f32 %v758_v48, %v744_v1  ;;  %v1486_v59 = vmul.f32 %v3572_v54, %v3571_v13  ;;  %v409_v12 = vmul.f32 %v1579_v37, %v3573_v22  ;;  %v3575_v61 = vld [vmem:[#allocation87_spill] sm:$0xff]  ;;  %v1582_v23 = vld [vmem:[%s3182_s2 + $0x40] sm:$0x3f]  ;;  %v3577_v57 = vld [vmem:[#allocation89_spill] sm:$0xff] }
  0x9c   :  { %v1136_v44 = vadd.f32 %v1122_v63, %v1108_v51  ;;  %v423_v10 = vmul.f32 %v1580_v47, %v3574_v35  ;;  %v745_v3 = vmul.f32 %v1581_v42, %v3575_v61  ;;  %v759_v29 = vmul.f32 %v1582_v23, %v3576_v28  ;;  %v1583_v0 = vld [vmem:[%s3183_s3 + $0x78] sm:$0x3f]  ;;  %v3578_v52 = vld [vmem:[#allocation90_spill] sm:$0xff]  ;;  %v1585_v33 = vld [vmem:[%s3183_s3 + $0xb0] sm:$0x3f] }
  0x9d   :  { %v1527_v50 = vadd.f32 %v1499_v49, %v1163_v60  ;;  %v800_v40 = vadd.f32 %v772_v7, %v436_v62  ;;  %v1500_v15 = vadd.f32 %v1486_v59, %v1472_v45  ;;  %v1109_v31 = vmul.f32 %v1583_v0, %v3577_v57  ;;  %v1584_v8 = vld [vmem:[%s3182_s2 + $0x78] sm:$0x3f]  ;;  %v3579_v4 = vld [vmem:[#allocation91_spill] sm:$0xff]  ;;  %v1586_v32 = vld [vmem:[%s3182_s2 + $0xb0] sm:$0x3f] }
  0x9e   :  { %v437_v58 = vadd.f32 %v423_v10, %v409_v12  ;;  %v1123_v38 = vmul.f32 %v1584_v8, %v3578_v52  ;;  %v1473_v1 = vmul.f32 %v1585_v33, %v3579_v4  ;;  %v773_v5 = vadd.f32 %v759_v29, %v745_v3  ;;  %v3580_v30 = vld [vmem:[#allocation92_spill] sm:$0xff]  ;;  %v3581_v49 = vld [vmem:[#allocation93_spill] sm:$0xff]  ;;  %v3582_v51 = vld [vmem:[#allocation94_spill] sm:$0xff] }
  0x9f   :  { %1555 = vst [vmem:[%s3185_s5 + $0x30] sm:$0x3f] %v1527_v50  ;;  %v1164_v55 = vadd.f32 %v1136_v44, %v800_v40  ;;  %v1487_v39 = vmul.f32 %v1586_v32, %v3580_v30  ;;  %v1587_v48 = vld [vmem:[%s3183_s3 + $0x10] sm:$0x3f]  ;;  %v1589_v36 = vld [vmem:[%s3183_s3 + $0x48] sm:$0x3f] }
  0xa0   :  { %v410_v62 = vmul.f32 %v1587_v48, %v3581_v49  ;;  %v1137_v34 = vadd.f32 %v1123_v38, %v1109_v31  ;;  %v1588_v53 = vld [vmem:[%s3182_s2 + $0x10] sm:$0x3f]  ;;  %v3583_v63 = vld [vmem:[#allocation95_spill] sm:$0xff]  ;;  %v801_v13 = vadd.f32 %v773_v5, %v437_v58  ;;  %v1591_v59 = vld [vmem:[%s3183_s3 + $0x80] sm:$0x3f] }
  0xa1   :  { %v424_v56 = vmul.f32 %v1588_v53, %v3582_v51  ;;  %v746_v60 = vmul.f32 %v1589_v36, %v3583_v63  ;;  %v1590_v7 = vld [vmem:[%s3182_s2 + $0x48] sm:$0x3f]  ;;  %v3584_v16 = vld [vmem:[#allocation96_spill] sm:$0xff]  ;;  %v1528_v45 = vadd.f32 %v1500_v15, %v1164_v55  ;;  %v1501_v54 = vadd.f32 %v1487_v39, %v1473_v1  ;;  %v3585_v44 = vld [vmem:[#allocation97_spill] sm:$0xff] }
  0xa2   :  { %v760_v2 = vmul.f32 %v1590_v7, %v3584_v16  ;;  %v1110_v37 = vmul.f32 %v1591_v59, %v3585_v44  ;;  %v1592_v47 = vld [vmem:[%s3182_s2 + $0x80] sm:$0x3f]  ;;  %v1593_v42 = vld [vmem:[%s3183_s3 + $0xb8] sm:$0x3f]  ;;  %v3587_v61 = vld [vmem:[#allocation99_spill] sm:$0xff]  ;;  %v1165_v50 = vadd.f32 %v1137_v34, %v801_v13 }
  0xa3   :  { %v438_v22 = vadd.f32 %v424_v56, %v410_v62  ;;  %v3586_v35 = vld [vmem:[#allocation98_spill] sm:$0xff]  ;;  %v1474_v3 = vmul.f32 %v1593_v42, %v3587_v61  ;;  %1556 = vst [vmem:[%s3185_s5 + $0x38] sm:$0x3f] %v1528_v45  ;;  %v1594_v40 = vld [vmem:[%s3182_s2 + $0xb8] sm:$0x3f]  ;;  %v3588_v15 = vld [vmem:[#allocation100_spill] sm:$0xff] }
  0xa4   :  { %v774_v12 = vadd.f32 %v760_v2, %v746_v60  ;;  %v1124_v10 = vmul.f32 %v1592_v47, %v3586_v35  ;;  %v1488_v23 = vmul.f32 %v1594_v40, %v3588_v15  ;;  %v1595_v28 = vld [vmem:[%s3183_s3 + $0x18] sm:$0x3f]  ;;  %v3590_v57 = vld [vmem:[#allocation102_spill] sm:$0xff]  ;;  %v1597_v38 = vld [vmem:[%s3183_s3 + $0x50] sm:$0x3f]  ;;  %v1529_v32 = vadd.f32 %v1501_v54, %v1165_v50 }
  0xa5   :  { %v3589_v29 = vld [vmem:[#allocation101_spill] sm:$0xff]  ;;  %v3591_v33 = vld [vmem:[#allocation103_spill] sm:$0xff]  ;;  %v1598_v1 = vld [vmem:[%s3182_s2 + $0x50] sm:$0x3f] }
  0xa6   :  { %v411_v58 = vmul.f32 %v1595_v28, %v3589_v29  ;;  %v1596_v0 = vld [vmem:[%s3182_s2 + $0x18] sm:$0x3f]  ;;  %v802_v8 = vadd.f32 %v774_v12, %v438_v22  ;;  %v1138_v52 = vadd.f32 %v1124_v10, %v1110_v37  ;;  %v747_v4 = vmul.f32 %v1597_v38, %v3591_v33  ;;  %v3592_v55 = vld [vmem:[#allocation104_spill] sm:$0xff]  ;;  %v1599_v48 = vld [vmem:[%s3183_s3 + $0x88] sm:$0x3f] }
  0xa7   :  { %v425_v31 = vmul.f32 %v1596_v0, %v3590_v57  ;;  %v761_v5 = vmul.f32 %v1598_v1, %v3592_v55  ;;  %v1502_v30 = vadd.f32 %v1488_v23, %v1474_v3  ;;  %v3593_v49 = vld [vmem:[#allocation105_spill] sm:$0xff]  ;;  %v1600_v51 = vld [vmem:[%s3182_s2 + $0x88] sm:$0x3f]  ;;  %v3594_v56 = vld [vmem:[#allocation106_spill] sm:$0xff]  ;;  %1557 = vst [vmem:[%s3185_s5 + $0x40] sm:$0x3f] %v1529_v32 }
  0xa8   :  { %v1111_v62 = vmul.f32 %v1599_v48, %v3593_v49  ;;  %v1166_v34 = vadd.f32 %v1138_v52, %v802_v8  ;;  %v1125_v36 = vmul.f32 %v1600_v51, %v3594_v56  ;;  %v1601_v63 = vld [vmem:[%s3183_s3 + $0xc0] sm:$0x3f]  ;;  %v3595_v60 = vld [vmem:[#allocation107_spill] sm:$0xff]  ;;  %v3596_v2 = vld [vmem:[#allocation108_spill] sm:$0xff] }
  0xa9   :  { %v439_v39 = vadd.f32 %v425_v31, %v411_v58  ;;  %v775_v53 = vadd.f32 %v761_v5, %v747_v4  ;;  %v1475_v7 = vmul.f32 %v1601_v63, %v3595_v60  ;;  %v1602_v16 = vld [vmem:[%s3182_s2 + $0xc0] sm:$0x3f]  ;;  %v3597_v54 = vld [vmem:[#allocation109_spill] sm:$0xff]  ;;  %v3600_v50 = vld [vmem:[#allocation111_spill] sm:$0xff] }
  0xaa   :  { %v1489_v45 = vmul.f32 %v1602_v16, %v3596_v2  ;;  %v1603_v13 = vld [vmem:[%s3183_s3 + $0x20] sm:$0x3f]  ;;  %v1605_v12 = vld [vmem:[%s3183_s3 + $0x58] sm:$0x3f]  ;;  %v1530_v10 = vadd.f32 %v1502_v30, %v1166_v34  ;;  %v1139_v61 = vadd.f32 %v1125_v36, %v1111_v62  ;;  %v1607_v28 = vld [vmem:[%s3183_s3 + $0x90] sm:$0x3f] }
  0xab   :  { %v412_v59 = vmul.f32 %v1603_v13, %v3597_v54  ;;  %v1604_v44 = vld [vmem:[%s3182_s2 + $0x20] sm:$0x3f]  ;;  %v803_v42 = vadd.f32 %v775_v53, %v439_v39  ;;  %v1606_v3 = vld [vmem:[%s3182_s2 + $0x58] sm:$0x3f]  ;;  %v3601_v29 = vld [vmem:[#allocation36_spill] sm:$0xff] }
  0xac   :  { %v3598_v37 = vld [vmem:[#allocation110_spill] sm:$0xff]  ;;  %v762_v40 = vmul.f32 %v1606_v3, %v3600_v50  ;;  %v1503_v15 = vadd.f32 %v1489_v45, %v1475_v7  ;;  %v1112_v58 = vmul.f32 %v1607_v28, %v3601_v29  ;;  %v1608_v0 = vld [vmem:[%s3182_s2 + $0x90] sm:$0x3f]  ;;  %v3602_v57 = vld [vmem:[#allocation37_spill] sm:$0xff]  ;;  %1558 = vst [vmem:[%s3185_s5 + $0x48] sm:$0x3f] %v1530_v10 }
  0xad   :  { %v426_v22 = vmul.f32 %v1604_v44, %v3598_v37  ;;  %v3599_v47 = vld [vmem:[#allocation34_spill] sm:$0xff]  ;;  %v1126_v31 = vmul.f32 %v1608_v0, %v3602_v57  ;;  %v1167_v8 = vadd.f32 %v1139_v61, %v803_v42  ;;  %v1609_v38 = vld [vmem:[%s3183_s3 + $0xc8] sm:$0x3f]  ;;  %v3603_v33 = vld [vmem:[#allocation112_spill] sm:$0xff] }
  0xae   :  { %v748_v35 = vmul.f32 %v1605_v12, %v3599_v47  ;;  %v1476_v4 = vmul.f32 %v1609_v38, %v3603_v33  ;;  %v1610_v1 = vld [vmem:[%s3182_s2 + $0xc8] sm:$0x3f]  ;;  %v3604_v55 = vld [vmem:[#allocation113_spill] sm:$0xff]  ;;  %v3605_v30 = vld [vmem:[#allocation114_spill] sm:$0xff] }
  0xaf   :  { %v440_v23 = vadd.f32 %v426_v22, %v412_v59  ;;  %v1490_v5 = vmul.f32 %v1610_v1, %v3604_v55  ;;  %v1140_v32 = vadd.f32 %v1126_v31, %v1112_v58  ;;  %v413_v39 = vmul.f32 %v3605_v30, %v3468_v27  ;;  %v3606_v48 = vld [vmem:[#allocation115_spill] sm:$0xff]  ;;  %v3607_v62 = vld [vmem:[#allocation116_spill] sm:$0xff]  ;;  %v3608_v36 = vld [vmem:[#allocation117_spill] sm:$0xff] }
  0xb0   :  { %v776_v52 = vadd.f32 %v762_v40, %v748_v35  ;;  %v427_v49 = vmul.f32 %v3606_v48, %v3541_v9  ;;  %v749_v34 = vmul.f32 %v3607_v62, %v3470_v14  ;;  %v1531_v53 = vadd.f32 %v1503_v15, %v1167_v8  ;;  %v3609_v7 = vld [vmem:[#allocation51_spill] sm:$0xff]  ;;  %v3610_v2 = vld [vmem:[#allocation53_spill] sm:$0xff]  ;;  %v3611_v27 = vld [vmem:[#allocation118_spill] sm:$0xff] }
  0xb1   :  { %v1504_v56 = vadd.f32 %v1490_v5, %v1476_v4  ;;  %v763_v63 = vmul.f32 %v3608_v36, %v3544_v43  ;;  %v1113_v16 = vmul.f32 %v3609_v7, %v3546_v19  ;;  %v1127_v45 = vmul.f32 %v3610_v2, %v3548_v6  ;;  %v3612_v54 = vld [vmem:[#allocation119_spill] sm:$0xff]  ;;  %v3613_v43 = vld [vmem:[#allocation120_spill] sm:$0xff]  ;;  %v3614_v19 = vld [vmem:[#allocation61_spill] sm:$0xff] }
  0xb2   :  { %v804_v51 = vadd.f32 %v776_v52, %v440_v23  ;;  %v441_v60 = vadd.f32 %v427_v49, %v413_v39  ;;  %v1477_v13 = vmul.f32 %v3611_v27, %v3479_v46  ;;  %1559 = vst [vmem:[%s3185_s5 + $0x50] sm:$0x3f] %v1531_v53  ;;  %v1491_v59 = vmul.f32 %v3612_v54, %v3478_v26  ;;  %v3615_v6 = vld [vmem:[#allocation62_spill] sm:$0xff]  ;;  %v3616_v46 = vld [vmem:[#allocation65_spill] sm:$0xff]  ;;  %v3617_v61 = vld [vmem:[#allocation67_spill] sm:$0xff] }
  0xb3   :  { %v777_v9 = vadd.f32 %v763_v63, %v749_v34  ;;  %v414_v44 = vmul.f32 %v3613_v43, %v2304_v20  ;;  %v1141_v37 = vadd.f32 %v1127_v45, %v1113_v16  ;;  %v428_v22 = vmul.f32 %v3614_v19, %v3480_v18  ;;  %v3618_v20 = vld [vmem:[#allocation68_spill] sm:$0xff]  ;;  %v3619_v15 = vld [vmem:[#allocation121_spill] sm:$0xff] }
  0xb4   :  { %v1168_v14 = vadd.f32 %v1140_v32, %v804_v51  ;;  %v750_v12 = vmul.f32 %v3615_v6, %v3485_v24  ;;  %v764_v47 = vmul.f32 %v3616_v46, %v3484_v41  ;;  %v1505_v42 = vadd.f32 %v1491_v59, %v1477_v13  ;;  %v3620_v41 = vld [vmem:[#allocation2_spill] sm:$0xff] }
  0xb5   :  { %v805_v10 = vadd.f32 %v777_v9, %v441_v60  ;;  %v1114_v3 = vmul.f32 %v3617_v61, %v2337_v25  ;;  %v442_v26 = vadd.f32 %v428_v22, %v414_v44  ;;  %v1128_v40 = vmul.f32 %v3618_v20, %v2332_v11 }
  0xb6   :  { %v1532_v35 = vadd.f32 %v1504_v56, %v1168_v14  ;;  %v778_v50 = vadd.f32 %v764_v47, %v750_v12  ;;  %v1478_v18 = vmul.f32 %v3619_v15, %v3496_v21  ;;  %v1492_v23 = vmul.f32 %v3620_v41, %v2354_v17 }
  0xb7   :  { %v1169_v24 = vadd.f32 %v1141_v37, %v805_v10  ;;  %v1142_v29 = vadd.f32 %v1128_v40, %v1114_v3 }
  0xb8   :  { %1560 = vst [vmem:[%s3185_s5 + $0x58] sm:$0x3f] %v1532_v35  ;;  %v806_v28 = vadd.f32 %v778_v50, %v442_v26  ;;  %v1506_v25 = vadd.f32 %v1492_v23, %v1478_v18 }
  0xb9   :  { %v1533_v58 = vadd.f32 %v1505_v42, %v1169_v24 }
  0xba   :  { %v1170_v0 = vadd.f32 %v1142_v29, %v806_v28 }
  0xbb   :  { %1561 = vst [vmem:[%s3185_s5 + $0x60] sm:$0x3f] %v1533_v58 }
  0xbc   :  { %v1534_v11 = vadd.f32 %v1506_v25, %v1170_v0 }
  0xbe   :  { %1562 = vst [vmem:[%s3185_s5 + $0x68] sm:$0x3f] %v1534_v11 }

// kernel: reverse.1
= control target key start
LH: loop header
LB: loop body
LE: loop exit
PB: predicated region body
PF: predicated region fallthrough
CT: control target
= control target key end

     0   :  { %s2024_s0 = inlined_call_operand.vmem [shape: f32[2,6,16,16,7], index: 0, kind: input, shape index: {}]   ;;  %s2025_s1 = inlined_call_operand.vmem [shape: f32[2,6,16,16,7], index: 1, kind: output, shape index: {}]  }
   0x1   :  { %v672_v0 = vld [vmem:[%s2024_s0 + $0x60] sm:$0xff]  ;;  %v675_v2 = vld [vmem:[%s2024_s0 + $0xd0] sm:$0xff] }
   0x2   :  { %v673_v1 = vld [vmem:[%s2024_s0 + $0x300] sm:$0xff]  ;;  %4 = vst [vmem:[%s2025_s1] sm:$0xff] %v672_v0  ;;  %676 = vst [vmem:[%s2025_s1 + $0x70] sm:$0xff] %v675_v2  ;;  %v677_v3 = vld [vmem:[%s2024_s0 + $0x370] sm:$0xff] }
   0x3   :  { %674 = vst [vmem:[%s2025_s1 + $0x2a0] sm:$0xff] %v673_v1  ;;  %v679_v4 = vld [vmem:[%s2024_s0 + $0x140] sm:$0xff]  ;;  %678 = vst [vmem:[%s2025_s1 + $0x310] sm:$0xff] %v677_v3  ;;  %v683_v6 = vld [vmem:[%s2024_s0 + $0x1b0] sm:$0xff] }
   0x4   :  { %v681_v5 = vld [vmem:[%s2024_s0 + $0x3e0] sm:$0xff]  ;;  %680 = vst [vmem:[%s2025_s1 + $0xe0] sm:$0xff] %v679_v4  ;;  %v685_v7 = vld [vmem:[%s2024_s0 + $0x450] sm:$0xff]  ;;  %684 = vst [vmem:[%s2025_s1 + $0x150] sm:$0xff] %v683_v6 }
   0x5   :  { %682 = vst [vmem:[%s2025_s1 + $0x380] sm:$0xff] %v681_v5  ;;  %v687_v8 = vld [vmem:[%s2024_s0 + $0x220] sm:$0xff]  ;;  %686 = vst [vmem:[%s2025_s1 + $0x3f0] sm:$0xff] %v685_v7  ;;  %v691_v10 = vld [vmem:[%s2024_s0 + $0x290] sm:$0xff] }
   0x6   :  { %688 = vst [vmem:[%s2025_s1 + $0x1c0] sm:$0xff] %v687_v8  ;;  %v689_v9 = vld [vmem:[%s2024_s0 + $0x4c0] sm:$0xff]  ;;  %v693_v11 = vld [vmem:[%s2024_s0 + $0x530] sm:$0xff]  ;;  %692 = vst [vmem:[%s2025_s1 + $0x230] sm:$0xff] %v691_v10 }
   0x7   :  { %690 = vst [vmem:[%s2025_s1 + $0x460] sm:$0xff] %v689_v9  ;;  %694 = vst [vmem:[%s2025_s1 + $0x4d0] sm:$0xff] %v693_v11  ;;  %v695_v12 = vld [vmem:[%s2024_s0 + $0x50] sm:$0xff]  ;;  %v699_v14 = vld [vmem:[%s2024_s0 + $0xc0] sm:$0xff] }
   0x8   :  { %v697_v13 = vld [vmem:[%s2024_s0 + $0x2f0] sm:$0xff]  ;;  %696 = vst [vmem:[%s2025_s1 + $0x10] sm:$0xff] %v695_v12  ;;  %700 = vst [vmem:[%s2025_s1 + $0x80] sm:$0xff] %v699_v14  ;;  %v701_v15 = vld [vmem:[%s2024_s0 + $0x360] sm:$0xff] }
   0x9   :  { %698 = vst [vmem:[%s2025_s1 + $0x2b0] sm:$0xff] %v697_v13  ;;  %v703_v16 = vld [vmem:[%s2024_s0 + $0x130] sm:$0xff]  ;;  %702 = vst [vmem:[%s2025_s1 + $0x320] sm:$0xff] %v701_v15  ;;  %v707_v18 = vld [vmem:[%s2024_s0 + $0x1a0] sm:$0xff] }
   0xa   :  { %v705_v17 = vld [vmem:[%s2024_s0 + $0x3d0] sm:$0xff]  ;;  %704 = vst [vmem:[%s2025_s1 + $0xf0] sm:$0xff] %v703_v16  ;;  %v709_v19 = vld [vmem:[%s2024_s0 + $0x440] sm:$0xff]  ;;  %708 = vst [vmem:[%s2025_s1 + $0x160] sm:$0xff] %v707_v18 }
   0xb   :  { %706 = vst [vmem:[%s2025_s1 + $0x390] sm:$0xff] %v705_v17  ;;  %v711_v20 = vld [vmem:[%s2024_s0 + $0x210] sm:$0xff]  ;;  %710 = vst [vmem:[%s2025_s1 + $0x400] sm:$0xff] %v709_v19  ;;  %v715_v22 = vld [vmem:[%s2024_s0 + $0x280] sm:$0xff] }
   0xc   :  { %712 = vst [vmem:[%s2025_s1 + $0x1d0] sm:$0xff] %v711_v20  ;;  %v713_v21 = vld [vmem:[%s2024_s0 + $0x4b0] sm:$0xff]  ;;  %v717_v23 = vld [vmem:[%s2024_s0 + $0x520] sm:$0xff]  ;;  %716 = vst [vmem:[%s2025_s1 + $0x240] sm:$0xff] %v715_v22 }
   0xd   :  { %714 = vst [vmem:[%s2025_s1 + $0x470] sm:$0xff] %v713_v21  ;;  %718 = vst [vmem:[%s2025_s1 + $0x4e0] sm:$0xff] %v717_v23  ;;  %v719_v24 = vld [vmem:[%s2024_s0 + $0x40] sm:$0xff]  ;;  %v723_v26 = vld [vmem:[%s2024_s0 + $0xb0] sm:$0xff] }
   0xe   :  { %v721_v25 = vld [vmem:[%s2024_s0 + $0x2e0] sm:$0xff]  ;;  %720 = vst [vmem:[%s2025_s1 + $0x20] sm:$0xff] %v719_v24  ;;  %724 = vst [vmem:[%s2025_s1 + $0x90] sm:$0xff] %v723_v26  ;;  %v725_v27 = vld [vmem:[%s2024_s0 + $0x350] sm:$0xff] }
   0xf   :  { %722 = vst [vmem:[%s2025_s1 + $0x2c0] sm:$0xff] %v721_v25  ;;  %v727_v28 = vld [vmem:[%s2024_s0 + $0x120] sm:$0xff]  ;;  %726 = vst [vmem:[%s2025_s1 + $0x330] sm:$0xff] %v725_v27  ;;  %v731_v30 = vld [vmem:[%s2024_s0 + $0x190] sm:$0xff] }
  0x10   :  { %v729_v29 = vld [vmem:[%s2024_s0 + $0x3c0] sm:$0xff]  ;;  %728 = vst [vmem:[%s2025_s1 + $0x100] sm:$0xff] %v727_v28  ;;  %v733_v31 = vld [vmem:[%s2024_s0 + $0x430] sm:$0xff]  ;;  %732 = vst [vmem:[%s2025_s1 + $0x170] sm:$0xff] %v731_v30 }
  0x11   :  { %730 = vst [vmem:[%s2025_s1 + $0x3a0] sm:$0xff] %v729_v29  ;;  %v735_v32 = vld [vmem:[%s2024_s0 + $0x200] sm:$0xff]  ;;  %734 = vst [vmem:[%s2025_s1 + $0x410] sm:$0xff] %v733_v31  ;;  %v739_v34 = vld [vmem:[%s2024_s0 + $0x270] sm:$0xff] }
  0x12   :  { %736 = vst [vmem:[%s2025_s1 + $0x1e0] sm:$0xff] %v735_v32  ;;  %v737_v33 = vld [vmem:[%s2024_s0 + $0x4a0] sm:$0xff]  ;;  %v741_v35 = vld [vmem:[%s2024_s0 + $0x510] sm:$0xff]  ;;  %740 = vst [vmem:[%s2025_s1 + $0x250] sm:$0xff] %v739_v34 }
  0x13   :  { %738 = vst [vmem:[%s2025_s1 + $0x480] sm:$0xff] %v737_v33  ;;  %742 = vst [vmem:[%s2025_s1 + $0x4f0] sm:$0xff] %v741_v35  ;;  %v743_v36 = vld [vmem:[%s2024_s0 + $0x30] sm:$0xff]  ;;  %v747_v38 = vld [vmem:[%s2024_s0 + $0xa0] sm:$0xff] }
  0x14   :  { %v745_v37 = vld [vmem:[%s2024_s0 + $0x2d0] sm:$0xff]  ;;  %744 = vst [vmem:[%s2025_s1 + $0x30] sm:$0xff] %v743_v36  ;;  %748 = vst [vmem:[%s2025_s1 + $0xa0] sm:$0xff] %v747_v38  ;;  %v749_v39 = vld [vmem:[%s2024_s0 + $0x340] sm:$0xff] }
  0x15   :  { %746 = vst [vmem:[%s2025_s1 + $0x2d0] sm:$0xff] %v745_v37  ;;  %v751_v40 = vld [vmem:[%s2024_s0 + $0x110] sm:$0xff]  ;;  %750 = vst [vmem:[%s2025_s1 + $0x340] sm:$0xff] %v749_v39  ;;  %v755_v42 = vld [vmem:[%s2024_s0 + $0x180] sm:$0xff] }
  0x16   :  { %v753_v41 = vld [vmem:[%s2024_s0 + $0x3b0] sm:$0xff]  ;;  %752 = vst [vmem:[%s2025_s1 + $0x110] sm:$0xff] %v751_v40  ;;  %v757_v43 = vld [vmem:[%s2024_s0 + $0x420] sm:$0xff]  ;;  %756 = vst [vmem:[%s2025_s1 + $0x180] sm:$0xff] %v755_v42 }
  0x17   :  { %754 = vst [vmem:[%s2025_s1 + $0x3b0] sm:$0xff] %v753_v41  ;;  %v759_v44 = vld [vmem:[%s2024_s0 + $0x1f0] sm:$0xff]  ;;  %758 = vst [vmem:[%s2025_s1 + $0x420] sm:$0xff] %v757_v43  ;;  %v763_v46 = vld [vmem:[%s2024_s0 + $0x260] sm:$0xff] }
  0x18   :  { %760 = vst [vmem:[%s2025_s1 + $0x1f0] sm:$0xff] %v759_v44  ;;  %v761_v45 = vld [vmem:[%s2024_s0 + $0x490] sm:$0xff]  ;;  %v765_v47 = vld [vmem:[%s2024_s0 + $0x500] sm:$0xff]  ;;  %764 = vst [vmem:[%s2025_s1 + $0x260] sm:$0xff] %v763_v46 }
  0x19   :  { %762 = vst [vmem:[%s2025_s1 + $0x490] sm:$0xff] %v761_v45  ;;  %766 = vst [vmem:[%s2025_s1 + $0x500] sm:$0xff] %v765_v47  ;;  %v767_v48 = vld [vmem:[%s2024_s0 + $0x20] sm:$0xff]  ;;  %v771_v50 = vld [vmem:[%s2024_s0 + $0x90] sm:$0xff] }
  0x1a   :  { %v769_v49 = vld [vmem:[%s2024_s0 + $0x2c0] sm:$0xff]  ;;  %768 = vst [vmem:[%s2025_s1 + $0x40] sm:$0xff] %v767_v48  ;;  %772 = vst [vmem:[%s2025_s1 + $0xb0] sm:$0xff] %v771_v50  ;;  %v773_v51 = vld [vmem:[%s2024_s0 + $0x330] sm:$0xff] }
  0x1b   :  { %770 = vst [vmem:[%s2025_s1 + $0x2e0] sm:$0xff] %v769_v49  ;;  %v775_v52 = vld [vmem:[%s2024_s0 + $0x100] sm:$0xff]  ;;  %774 = vst [vmem:[%s2025_s1 + $0x350] sm:$0xff] %v773_v51  ;;  %v779_v54 = vld [vmem:[%s2024_s0 + $0x170] sm:$0xff] }
  0x1c   :  { %v777_v53 = vld [vmem:[%s2024_s0 + $0x3a0] sm:$0xff]  ;;  %776 = vst [vmem:[%s2025_s1 + $0x120] sm:$0xff] %v775_v52  ;;  %v781_v55 = vld [vmem:[%s2024_s0 + $0x410] sm:$0xff]  ;;  %780 = vst [vmem:[%s2025_s1 + $0x190] sm:$0xff] %v779_v54 }
  0x1d   :  { %778 = vst [vmem:[%s2025_s1 + $0x3c0] sm:$0xff] %v777_v53  ;;  %v783_v56 = vld [vmem:[%s2024_s0 + $0x1e0] sm:$0xff]  ;;  %782 = vst [vmem:[%s2025_s1 + $0x430] sm:$0xff] %v781_v55  ;;  %v787_v58 = vld [vmem:[%s2024_s0 + $0x250] sm:$0xff] }
  0x1e   :  { %784 = vst [vmem:[%s2025_s1 + $0x200] sm:$0xff] %v783_v56  ;;  %v785_v57 = vld [vmem:[%s2024_s0 + $0x480] sm:$0xff]  ;;  %v789_v59 = vld [vmem:[%s2024_s0 + $0x4f0] sm:$0xff]  ;;  %788 = vst [vmem:[%s2025_s1 + $0x270] sm:$0xff] %v787_v58 }
  0x1f   :  { %786 = vst [vmem:[%s2025_s1 + $0x4a0] sm:$0xff] %v785_v57  ;;  %790 = vst [vmem:[%s2025_s1 + $0x510] sm:$0xff] %v789_v59  ;;  %v791_v60 = vld [vmem:[%s2024_s0 + $0x10] sm:$0xff]  ;;  %v795_v62 = vld [vmem:[%s2024_s0 + $0x80] sm:$0xff] }
  0x20   :  { %v793_v61 = vld [vmem:[%s2024_s0 + $0x2b0] sm:$0xff]  ;;  %792 = vst [vmem:[%s2025_s1 + $0x50] sm:$0xff] %v791_v60  ;;  %796 = vst [vmem:[%s2025_s1 + $0xc0] sm:$0xff] %v795_v62  ;;  %v797_v63 = vld [vmem:[%s2024_s0 + $0x320] sm:$0xff] }
  0x21   :  { %794 = vst [vmem:[%s2025_s1 + $0x2f0] sm:$0xff] %v793_v61  ;;  %v799_v0 = vld [vmem:[%s2024_s0 + $0xf0] sm:$0xff]  ;;  %798 = vst [vmem:[%s2025_s1 + $0x360] sm:$0xff] %v797_v63  ;;  %v803_v2 = vld [vmem:[%s2024_s0 + $0x160] sm:$0xff] }
  0x22   :  { %v801_v1 = vld [vmem:[%s2024_s0 + $0x390] sm:$0xff]  ;;  %800 = vst [vmem:[%s2025_s1 + $0x130] sm:$0xff] %v799_v0  ;;  %v805_v3 = vld [vmem:[%s2024_s0 + $0x400] sm:$0xff]  ;;  %804 = vst [vmem:[%s2025_s1 + $0x1a0] sm:$0xff] %v803_v2 }
  0x23   :  { %802 = vst [vmem:[%s2025_s1 + $0x3d0] sm:$0xff] %v801_v1  ;;  %v807_v4 = vld [vmem:[%s2024_s0 + $0x1d0] sm:$0xff]  ;;  %806 = vst [vmem:[%s2025_s1 + $0x440] sm:$0xff] %v805_v3  ;;  %v811_v6 = vld [vmem:[%s2024_s0 + $0x240] sm:$0xff] }
  0x24   :  { %808 = vst [vmem:[%s2025_s1 + $0x210] sm:$0xff] %v807_v4  ;;  %v809_v5 = vld [vmem:[%s2024_s0 + $0x470] sm:$0xff]  ;;  %v813_v7 = vld [vmem:[%s2024_s0 + $0x4e0] sm:$0xff]  ;;  %812 = vst [vmem:[%s2025_s1 + $0x280] sm:$0xff] %v811_v6 }
  0x25   :  { %810 = vst [vmem:[%s2025_s1 + $0x4b0] sm:$0xff] %v809_v5  ;;  %814 = vst [vmem:[%s2025_s1 + $0x520] sm:$0xff] %v813_v7  ;;  %v289_v8 = vld [vmem:[%s2024_s0] sm:$0xff]  ;;  %v818_v10 = vld [vmem:[%s2024_s0 + $0x70] sm:$0xff] }
  0x26   :  { %v816_v9 = vld [vmem:[%s2024_s0 + $0x2a0] sm:$0xff]  ;;  %815 = vst [vmem:[%s2025_s1 + $0x60] sm:$0xff] %v289_v8  ;;  %819 = vst [vmem:[%s2025_s1 + $0xd0] sm:$0xff] %v818_v10  ;;  %v820_v11 = vld [vmem:[%s2024_s0 + $0x310] sm:$0xff] }
  0x27   :  { %817 = vst [vmem:[%s2025_s1 + $0x300] sm:$0xff] %v816_v9  ;;  %v822_v12 = vld [vmem:[%s2024_s0 + $0xe0] sm:$0xff]  ;;  %821 = vst [vmem:[%s2025_s1 + $0x370] sm:$0xff] %v820_v11  ;;  %v826_v14 = vld [vmem:[%s2024_s0 + $0x150] sm:$0xff] }
  0x28   :  { %v824_v13 = vld [vmem:[%s2024_s0 + $0x380] sm:$0xff]  ;;  %823 = vst [vmem:[%s2025_s1 + $0x140] sm:$0xff] %v822_v12  ;;  %v828_v15 = vld [vmem:[%s2024_s0 + $0x3f0] sm:$0xff]  ;;  %827 = vst [vmem:[%s2025_s1 + $0x1b0] sm:$0xff] %v826_v14 }
  0x29   :  { %825 = vst [vmem:[%s2025_s1 + $0x3e0] sm:$0xff] %v824_v13  ;;  %v830_v16 = vld [vmem:[%s2024_s0 + $0x1c0] sm:$0xff]  ;;  %829 = vst [vmem:[%s2025_s1 + $0x450] sm:$0xff] %v828_v15  ;;  %v834_v18 = vld [vmem:[%s2024_s0 + $0x230] sm:$0xff] }
  0x2a   :  { %831 = vst [vmem:[%s2025_s1 + $0x220] sm:$0xff] %v830_v16  ;;  %v832_v17 = vld [vmem:[%s2024_s0 + $0x460] sm:$0xff]  ;;  %v836_v19 = vld [vmem:[%s2024_s0 + $0x4d0] sm:$0xff]  ;;  %835 = vst [vmem:[%s2025_s1 + $0x290] sm:$0xff] %v834_v18 }
  0x2b   :  { %833 = vst [vmem:[%s2025_s1 + $0x4c0] sm:$0xff] %v832_v17  ;;  %837 = vst [vmem:[%s2025_s1 + $0x530] sm:$0xff] %v836_v19  ;;  %v838_v20 = vld [vmem:[%s2024_s0 + $0x68] sm:$0xff]  ;;  %v842_v22 = vld [vmem:[%s2024_s0 + $0xd8] sm:$0xff] }
  0x2c   :  { %v840_v21 = vld [vmem:[%s2024_s0 + $0x308] sm:$0xff]  ;;  %839 = vst [vmem:[%s2025_s1 + $0x8] sm:$0xff] %v838_v20  ;;  %843 = vst [vmem:[%s2025_s1 + $0x78] sm:$0xff] %v842_v22  ;;  %v844_v23 = vld [vmem:[%s2024_s0 + $0x378] sm:$0xff] }
  0x2d   :  { %841 = vst [vmem:[%s2025_s1 + $0x2a8] sm:$0xff] %v840_v21  ;;  %v846_v24 = vld [vmem:[%s2024_s0 + $0x148] sm:$0xff]  ;;  %845 = vst [vmem:[%s2025_s1 + $0x318] sm:$0xff] %v844_v23  ;;  %v850_v26 = vld [vmem:[%s2024_s0 + $0x1b8] sm:$0xff] }
  0x2e   :  { %v848_v25 = vld [vmem:[%s2024_s0 + $0x3e8] sm:$0xff]  ;;  %847 = vst [vmem:[%s2025_s1 + $0xe8] sm:$0xff] %v846_v24  ;;  %v852_v27 = vld [vmem:[%s2024_s0 + $0x458] sm:$0xff]  ;;  %851 = vst [vmem:[%s2025_s1 + $0x158] sm:$0xff] %v850_v26 }
  0x2f   :  { %849 = vst [vmem:[%s2025_s1 + $0x388] sm:$0xff] %v848_v25  ;;  %v854_v28 = vld [vmem:[%s2024_s0 + $0x228] sm:$0xff]  ;;  %853 = vst [vmem:[%s2025_s1 + $0x3f8] sm:$0xff] %v852_v27  ;;  %v858_v30 = vld [vmem:[%s2024_s0 + $0x298] sm:$0xff] }
  0x30   :  { %855 = vst [vmem:[%s2025_s1 + $0x1c8] sm:$0xff] %v854_v28  ;;  %v856_v29 = vld [vmem:[%s2024_s0 + $0x4c8] sm:$0xff]  ;;  %v860_v31 = vld [vmem:[%s2024_s0 + $0x538] sm:$0xff]  ;;  %859 = vst [vmem:[%s2025_s1 + $0x238] sm:$0xff] %v858_v30 }
  0x31   :  { %857 = vst [vmem:[%s2025_s1 + $0x468] sm:$0xff] %v856_v29  ;;  %861 = vst [vmem:[%s2025_s1 + $0x4d8] sm:$0xff] %v860_v31  ;;  %v862_v32 = vld [vmem:[%s2024_s0 + $0x58] sm:$0xff]  ;;  %v866_v34 = vld [vmem:[%s2024_s0 + $0xc8] sm:$0xff] }
  0x32   :  { %v864_v33 = vld [vmem:[%s2024_s0 + $0x2f8] sm:$0xff]  ;;  %863 = vst [vmem:[%s2025_s1 + $0x18] sm:$0xff] %v862_v32  ;;  %867 = vst [vmem:[%s2025_s1 + $0x88] sm:$0xff] %v866_v34  ;;  %v868_v35 = vld [vmem:[%s2024_s0 + $0x368] sm:$0xff] }
  0x33   :  { %865 = vst [vmem:[%s2025_s1 + $0x2b8] sm:$0xff] %v864_v33  ;;  %v870_v36 = vld [vmem:[%s2024_s0 + $0x138] sm:$0xff]  ;;  %869 = vst [vmem:[%s2025_s1 + $0x328] sm:$0xff] %v868_v35  ;;  %v874_v38 = vld [vmem:[%s2024_s0 + $0x1a8] sm:$0xff] }
  0x34   :  { %v872_v37 = vld [vmem:[%s2024_s0 + $0x3d8] sm:$0xff]  ;;  %871 = vst [vmem:[%s2025_s1 + $0xf8] sm:$0xff] %v870_v36  ;;  %v876_v39 = vld [vmem:[%s2024_s0 + $0x448] sm:$0xff]  ;;  %875 = vst [vmem:[%s2025_s1 + $0x168] sm:$0xff] %v874_v38 }
  0x35   :  { %873 = vst [vmem:[%s2025_s1 + $0x398] sm:$0xff] %v872_v37  ;;  %v878_v40 = vld [vmem:[%s2024_s0 + $0x218] sm:$0xff]  ;;  %877 = vst [vmem:[%s2025_s1 + $0x408] sm:$0xff] %v876_v39  ;;  %v882_v42 = vld [vmem:[%s2024_s0 + $0x288] sm:$0xff] }
  0x36   :  { %879 = vst [vmem:[%s2025_s1 + $0x1d8] sm:$0xff] %v878_v40  ;;  %v880_v41 = vld [vmem:[%s2024_s0 + $0x4b8] sm:$0xff]  ;;  %v884_v43 = vld [vmem:[%s2024_s0 + $0x528] sm:$0xff]  ;;  %883 = vst [vmem:[%s2025_s1 + $0x248] sm:$0xff] %v882_v42 }
  0x37   :  { %881 = vst [vmem:[%s2025_s1 + $0x478] sm:$0xff] %v880_v41  ;;  %885 = vst [vmem:[%s2025_s1 + $0x4e8] sm:$0xff] %v884_v43  ;;  %v886_v44 = vld [vmem:[%s2024_s0 + $0x48] sm:$0xff]  ;;  %v890_v46 = vld [vmem:[%s2024_s0 + $0xb8] sm:$0xff] }
  0x38   :  { %v888_v45 = vld [vmem:[%s2024_s0 + $0x2e8] sm:$0xff]  ;;  %887 = vst [vmem:[%s2025_s1 + $0x28] sm:$0xff] %v886_v44  ;;  %891 = vst [vmem:[%s2025_s1 + $0x98] sm:$0xff] %v890_v46  ;;  %v892_v47 = vld [vmem:[%s2024_s0 + $0x358] sm:$0xff] }
  0x39   :  { %889 = vst [vmem:[%s2025_s1 + $0x2c8] sm:$0xff] %v888_v45  ;;  %v894_v48 = vld [vmem:[%s2024_s0 + $0x128] sm:$0xff]  ;;  %893 = vst [vmem:[%s2025_s1 + $0x338] sm:$0xff] %v892_v47  ;;  %v898_v50 = vld [vmem:[%s2024_s0 + $0x198] sm:$0xff] }
  0x3a   :  { %v896_v49 = vld [vmem:[%s2024_s0 + $0x3c8] sm:$0xff]  ;;  %895 = vst [vmem:[%s2025_s1 + $0x108] sm:$0xff] %v894_v48  ;;  %v900_v51 = vld [vmem:[%s2024_s0 + $0x438] sm:$0xff]  ;;  %899 = vst [vmem:[%s2025_s1 + $0x178] sm:$0xff] %v898_v50 }
  0x3b   :  { %897 = vst [vmem:[%s2025_s1 + $0x3a8] sm:$0xff] %v896_v49  ;;  %v902_v52 = vld [vmem:[%s2024_s0 + $0x208] sm:$0xff]  ;;  %901 = vst [vmem:[%s2025_s1 + $0x418] sm:$0xff] %v900_v51  ;;  %v906_v54 = vld [vmem:[%s2024_s0 + $0x278] sm:$0xff] }
  0x3c   :  { %903 = vst [vmem:[%s2025_s1 + $0x1e8] sm:$0xff] %v902_v52  ;;  %v904_v53 = vld [vmem:[%s2024_s0 + $0x4a8] sm:$0xff]  ;;  %v908_v55 = vld [vmem:[%s2024_s0 + $0x518] sm:$0xff]  ;;  %907 = vst [vmem:[%s2025_s1 + $0x258] sm:$0xff] %v906_v54 }
  0x3d   :  { %905 = vst [vmem:[%s2025_s1 + $0x488] sm:$0xff] %v904_v53  ;;  %909 = vst [vmem:[%s2025_s1 + $0x4f8] sm:$0xff] %v908_v55  ;;  %v910_v56 = vld [vmem:[%s2024_s0 + $0x38] sm:$0xff]  ;;  %v914_v58 = vld [vmem:[%s2024_s0 + $0xa8] sm:$0xff] }
  0x3e   :  { %v912_v57 = vld [vmem:[%s2024_s0 + $0x2d8] sm:$0xff]  ;;  %911 = vst [vmem:[%s2025_s1 + $0x38] sm:$0xff] %v910_v56  ;;  %915 = vst [vmem:[%s2025_s1 + $0xa8] sm:$0xff] %v914_v58  ;;  %v916_v59 = vld [vmem:[%s2024_s0 + $0x348] sm:$0xff] }
  0x3f   :  { %913 = vst [vmem:[%s2025_s1 + $0x2d8] sm:$0xff] %v912_v57  ;;  %v918_v60 = vld [vmem:[%s2024_s0 + $0x118] sm:$0xff]  ;;  %917 = vst [vmem:[%s2025_s1 + $0x348] sm:$0xff] %v916_v59  ;;  %v922_v62 = vld [vmem:[%s2024_s0 + $0x188] sm:$0xff] }
  0x40   :  { %v920_v61 = vld [vmem:[%s2024_s0 + $0x3b8] sm:$0xff]  ;;  %919 = vst [vmem:[%s2025_s1 + $0x118] sm:$0xff] %v918_v60  ;;  %v924_v63 = vld [vmem:[%s2024_s0 + $0x428] sm:$0xff]  ;;  %923 = vst [vmem:[%s2025_s1 + $0x188] sm:$0xff] %v922_v62 }
  0x41   :  { %921 = vst [vmem:[%s2025_s1 + $0x3b8] sm:$0xff] %v920_v61  ;;  %v926_v0 = vld [vmem:[%s2024_s0 + $0x1f8] sm:$0xff]  ;;  %925 = vst [vmem:[%s2025_s1 + $0x428] sm:$0xff] %v924_v63  ;;  %v930_v2 = vld [vmem:[%s2024_s0 + $0x268] sm:$0xff] }
  0x42   :  { %927 = vst [vmem:[%s2025_s1 + $0x1f8] sm:$0xff] %v926_v0  ;;  %v928_v1 = vld [vmem:[%s2024_s0 + $0x498] sm:$0xff]  ;;  %v932_v3 = vld [vmem:[%s2024_s0 + $0x508] sm:$0xff]  ;;  %931 = vst [vmem:[%s2025_s1 + $0x268] sm:$0xff] %v930_v2 }
  0x43   :  { %929 = vst [vmem:[%s2025_s1 + $0x498] sm:$0xff] %v928_v1  ;;  %933 = vst [vmem:[%s2025_s1 + $0x508] sm:$0xff] %v932_v3  ;;  %v934_v4 = vld [vmem:[%s2024_s0 + $0x28] sm:$0xff]  ;;  %v938_v6 = vld [vmem:[%s2024_s0 + $0x98] sm:$0xff] }
  0x44   :  { %v936_v5 = vld [vmem:[%s2024_s0 + $0x2c8] sm:$0xff]  ;;  %935 = vst [vmem:[%s2025_s1 + $0x48] sm:$0xff] %v934_v4  ;;  %939 = vst [vmem:[%s2025_s1 + $0xb8] sm:$0xff] %v938_v6  ;;  %v940_v7 = vld [vmem:[%s2024_s0 + $0x338] sm:$0xff] }
  0x45   :  { %937 = vst [vmem:[%s2025_s1 + $0x2e8] sm:$0xff] %v936_v5  ;;  %v942_v8 = vld [vmem:[%s2024_s0 + $0x108] sm:$0xff]  ;;  %941 = vst [vmem:[%s2025_s1 + $0x358] sm:$0xff] %v940_v7  ;;  %v946_v10 = vld [vmem:[%s2024_s0 + $0x178] sm:$0xff] }
  0x46   :  { %v944_v9 = vld [vmem:[%s2024_s0 + $0x3a8] sm:$0xff]  ;;  %943 = vst [vmem:[%s2025_s1 + $0x128] sm:$0xff] %v942_v8  ;;  %v948_v11 = vld [vmem:[%s2024_s0 + $0x418] sm:$0xff]  ;;  %947 = vst [vmem:[%s2025_s1 + $0x198] sm:$0xff] %v946_v10 }
  0x47   :  { %945 = vst [vmem:[%s2025_s1 + $0x3c8] sm:$0xff] %v944_v9  ;;  %v950_v12 = vld [vmem:[%s2024_s0 + $0x1e8] sm:$0xff]  ;;  %949 = vst [vmem:[%s2025_s1 + $0x438] sm:$0xff] %v948_v11  ;;  %v954_v14 = vld [vmem:[%s2024_s0 + $0x258] sm:$0xff] }
  0x48   :  { %951 = vst [vmem:[%s2025_s1 + $0x208] sm:$0xff] %v950_v12  ;;  %v952_v13 = vld [vmem:[%s2024_s0 + $0x488] sm:$0xff]  ;;  %v956_v15 = vld [vmem:[%s2024_s0 + $0x4f8] sm:$0xff]  ;;  %955 = vst [vmem:[%s2025_s1 + $0x278] sm:$0xff] %v954_v14 }
  0x49   :  { %953 = vst [vmem:[%s2025_s1 + $0x4a8] sm:$0xff] %v952_v13  ;;  %957 = vst [vmem:[%s2025_s1 + $0x518] sm:$0xff] %v956_v15  ;;  %v958_v16 = vld [vmem:[%s2024_s0 + $0x18] sm:$0xff]  ;;  %v962_v18 = vld [vmem:[%s2024_s0 + $0x88] sm:$0xff] }
  0x4a   :  { %v960_v17 = vld [vmem:[%s2024_s0 + $0x2b8] sm:$0xff]  ;;  %959 = vst [vmem:[%s2025_s1 + $0x58] sm:$0xff] %v958_v16  ;;  %963 = vst [vmem:[%s2025_s1 + $0xc8] sm:$0xff] %v962_v18  ;;  %v964_v19 = vld [vmem:[%s2024_s0 + $0x328] sm:$0xff] }
  0x4b   :  { %961 = vst [vmem:[%s2025_s1 + $0x2f8] sm:$0xff] %v960_v17  ;;  %v966_v20 = vld [vmem:[%s2024_s0 + $0xf8] sm:$0xff]  ;;  %965 = vst [vmem:[%s2025_s1 + $0x368] sm:$0xff] %v964_v19  ;;  %v970_v22 = vld [vmem:[%s2024_s0 + $0x168] sm:$0xff] }
  0x4c   :  { %v968_v21 = vld [vmem:[%s2024_s0 + $0x398] sm:$0xff]  ;;  %967 = vst [vmem:[%s2025_s1 + $0x138] sm:$0xff] %v966_v20  ;;  %v972_v23 = vld [vmem:[%s2024_s0 + $0x408] sm:$0xff]  ;;  %971 = vst [vmem:[%s2025_s1 + $0x1a8] sm:$0xff] %v970_v22 }
  0x4d   :  { %969 = vst [vmem:[%s2025_s1 + $0x3d8] sm:$0xff] %v968_v21  ;;  %v974_v24 = vld [vmem:[%s2024_s0 + $0x1d8] sm:$0xff]  ;;  %973 = vst [vmem:[%s2025_s1 + $0x448] sm:$0xff] %v972_v23  ;;  %v978_v26 = vld [vmem:[%s2024_s0 + $0x248] sm:$0xff] }
  0x4e   :  { %975 = vst [vmem:[%s2025_s1 + $0x218] sm:$0xff] %v974_v24  ;;  %v976_v25 = vld [vmem:[%s2024_s0 + $0x478] sm:$0xff]  ;;  %v980_v27 = vld [vmem:[%s2024_s0 + $0x4e8] sm:$0xff]  ;;  %979 = vst [vmem:[%s2025_s1 + $0x288] sm:$0xff] %v978_v26 }
  0x4f   :  { %977 = vst [vmem:[%s2025_s1 + $0x4b8] sm:$0xff] %v976_v25  ;;  %981 = vst [vmem:[%s2025_s1 + $0x528] sm:$0xff] %v980_v27  ;;  %v982_v28 = vld [vmem:[%s2024_s0 + $0x8] sm:$0xff]  ;;  %v986_v30 = vld [vmem:[%s2024_s0 + $0x78] sm:$0xff] }
  0x50   :  { %v984_v29 = vld [vmem:[%s2024_s0 + $0x2a8] sm:$0xff]  ;;  %983 = vst [vmem:[%s2025_s1 + $0x68] sm:$0xff] %v982_v28  ;;  %987 = vst [vmem:[%s2025_s1 + $0xd8] sm:$0xff] %v986_v30  ;;  %v988_v31 = vld [vmem:[%s2024_s0 + $0x318] sm:$0xff] }
  0x51   :  { %985 = vst [vmem:[%s2025_s1 + $0x308] sm:$0xff] %v984_v29  ;;  %v990_v32 = vld [vmem:[%s2024_s0 + $0xe8] sm:$0xff]  ;;  %989 = vst [vmem:[%s2025_s1 + $0x378] sm:$0xff] %v988_v31  ;;  %v994_v34 = vld [vmem:[%s2024_s0 + $0x158] sm:$0xff] }
  0x52   :  { %v992_v33 = vld [vmem:[%s2024_s0 + $0x388] sm:$0xff]  ;;  %991 = vst [vmem:[%s2025_s1 + $0x148] sm:$0xff] %v990_v32  ;;  %v996_v35 = vld [vmem:[%s2024_s0 + $0x3f8] sm:$0xff]  ;;  %995 = vst [vmem:[%s2025_s1 + $0x1b8] sm:$0xff] %v994_v34 }
  0x53   :  { %993 = vst [vmem:[%s2025_s1 + $0x3e8] sm:$0xff] %v992_v33  ;;  %v998_v36 = vld [vmem:[%s2024_s0 + $0x1c8] sm:$0xff]  ;;  %997 = vst [vmem:[%s2025_s1 + $0x458] sm:$0xff] %v996_v35  ;;  %v1002_v38 = vld [vmem:[%s2024_s0 + $0x238] sm:$0xff] }
  0x54   :  { %999 = vst [vmem:[%s2025_s1 + $0x228] sm:$0xff] %v998_v36  ;;  %v1000_v37 = vld [vmem:[%s2024_s0 + $0x468] sm:$0xff]  ;;  %v1004_v39 = vld [vmem:[%s2024_s0 + $0x4d8] sm:$0xff]  ;;  %1003 = vst [vmem:[%s2025_s1 + $0x298] sm:$0xff] %v1002_v38 }
  0x55   :  { %1001 = vst [vmem:[%s2025_s1 + $0x4c8] sm:$0xff] %v1000_v37  ;;  %1005 = vst [vmem:[%s2025_s1 + $0x538] sm:$0xff] %v1004_v39 }

</bundles_post_ra>
